<compile_context>
chip_gen: v7x
topology: tpu7x:2x2x1
jax: 0.10.0
libtpu: 0.0.40
codegen_flags: <defaults>
</compile_context>

<pallas_src>
import jax
import jax.numpy as jnp
from jax import lax
from jax.experimental import pallas as pl
from jax.experimental.pallas import tpu as pltpu

KH = KW = 7
PAD = (KH - 1) // 2  # 3


def _round_up(n, m):
    return ((n + m - 1) // m) * m


def _pick_batch_tile(B, per_batch_io_bytes, target_bytes=8 * 1024 * 1024):
    """Largest divisor of B with ~target per-step IO, keeping >=2 steps when B >= 2."""
    bt = int(min(B, max(1, target_bytes // max(per_batch_io_bytes, 1))))
    while B % bt != 0:
        bt -= 1
    if B >= 2 and B // bt < 2:          # keep both v7x TensorCores busy
        bt = max(1, B // 2)
        while B % bt != 0:
            bt -= 1
    return max(bt, 1)


def _make_kernel(Bt, C, W, HWp, LPAD, L):
    RPAD = L - LPAD - HWp
    inv_c = 1.0 / C

    def kernel(w_ref, b_ref, cmask_ref, x_ref, o_ref, pad_ref):
        """One batch tile per grid step.

        w_ref    : SMEM f32[2*7*7]        BN-folded conv weight, flattened (c, kh, kw)
        b_ref    : SMEM f32[1]            BN-folded bias
        cmask_ref: VMEM f32[7, HWp]       grid-invariant column-validity masks (one per kj)
        x_ref    : VMEM [Bt, C, HWp]      lane-dense input block
        o_ref    : VMEM [Bt, C, HWp]      lane-dense output block
        pad_ref  : VMEM f32[2, Bt, L]     scratch: flat zero-padded pooled maps
        """
        # Zero only the halo strips (interior is fully overwritten below; taps never
        # write into the halos).  Both strips are 128-lane aligned.
        pad_ref[:, :, :LPAD] = jnp.zeros((2, Bt, LPAD), jnp.float32)
        pad_ref[:, :, LPAD + HWp:] = jnp.zeros((2, Bt, RPAD), jnp.float32)

        x = x_ref[...]                                   # (Bt, C, HWp), input dtype

        # --- ChannelPool: max & mean over channels (no persistent f32 copy of x) ----
        pmax = jnp.max(x, axis=1).astype(jnp.float32)            # (Bt, HWp)
        pmean = jnp.sum(x, axis=1, dtype=jnp.float32) * inv_c    # (Bt, HWp)

        # Flat zero-padded pooled maps; the zero halo reproduces the conv's zero
        # padding for out-of-range rows.  Interior stores are lane-aligned (LPAD%128==0).
        pad_ref[0, :, LPAD:LPAD + HWp] = pmax
        pad_ref[1, :, LPAD:LPAD + HWp] = pmean

        cm = cmask_ref[...]                              # (7, HWp)

        # --- 7x7 conv, 2 in-channels -> 1 out-channel (BN folded into w/b) ----------
        # kj-outer / ki-inner: 7 mask multiplies total; row validity falls out of the
        # flat zero halo, column validity out of the precomputed masks.
        acc = jnp.full((Bt, HWp), b_ref[0], dtype=jnp.float32)
        for kj in range(KW):
            dj = kj - PAD
            partial = None
            for ki in range(KH):
                di = ki - PAD
                start = LPAD + di * W + dj
                s = pad_ref[:, :, start:start + HWp]     # (2, Bt, HWp) zero-filled shift
                t = (w_ref[ki * KW + kj] * s[0]
                     + w_ref[KH * KW + ki * KW + kj] * s[1])
                partial = t if partial is None else partial + t
            acc = acc + partial * cm[kj:kj + 1]

        # --- sigmoid gate and broadcast multiply (lane-dense store, input dtype) ----
        gate = jax.nn.sigmoid(acc).astype(x.dtype)       # (Bt, HWp)
        o_ref[...] = x * gate[:, None, :]

    return kernel


def spatial_attention_block(x, conv_w, bn_gamma, bn_beta, bn_mean, bn_var, eps=1e-5):
    """x: [B, C, H, W] (NCHW). conv_w: f32[1, 2, 7, 7]. BN params: f32[1]."""
    B, C, H, W = x.shape
    HW = H * W
    HWp = _round_up(HW, 128)                 # lane-aligned trailing dim
    ZPAD = PAD * W + PAD                     # flat halo wide enough for any (ki, kj) shift
    LPAD = _round_up(ZPAD, 128)              # 128-aligned left halo -> aligned interior stores
    RPAD = _round_up(ZPAD, 128)
    L = LPAD + HWp + RPAD

    # Fold eval-mode BatchNorm into the (bias-free) conv.
    scale = bn_gamma / jnp.sqrt(bn_var + eps)                           # (1,)
    w_folded = (conv_w[0] * scale[0]).reshape(-1).astype(jnp.float32)   # (2*7*7,)
    b_folded = (bn_beta - bn_mean * scale).astype(jnp.float32)          # (1,)

    # Grid-invariant column-validity masks (one per kj), precomputed on the host.
    cols = jnp.arange(HWp, dtype=jnp.int32) % W
    offs = jnp.arange(KW, dtype=jnp.int32) - PAD
    shifted = cols[None, :] + offs[:, None]
    col_masks = jnp.logical_and(shifted >= 0, shifted < W).astype(jnp.float32)  # (7, HWp)

    # Collapse spatial dims -> lane-dense trailing dim; pad only if not 128-aligned.
    x2 = x.reshape(B, C, HW)
    if HWp != HW:
        x2 = jnp.pad(x2, ((0, 0), (0, 0), (0, HWp - HW)))

    itemsize = jnp.dtype(x.dtype).itemsize
    per_batch_io = 2 * C * HWp * itemsize                 # in + out bytes per batch element
    Bt = _pick_batch_tile(B, per_batch_io)
    grid = B // Bt

    kernel = _make_kernel(Bt, C, W, HWp, LPAD, L)

    # Derive the VMEM limit from the actual pipeline footprint (keeps v7x's 64 MiB happy).
    blk_io = Bt * C * HWp * itemsize
    vmem_needed = (4 * blk_io                 # double-buffered input + output blocks
                   + 2 * KW * HWp * 4         # resident column masks (+ slack)
                   + 2 * Bt * L * 4           # pad scratch
                   + 8 * Bt * HWp * 4         # f32 temporaries (pool / partial / acc / gate)
                   + (2 << 20))               # headroom
    vmem_limit = int(min(max(vmem_needed, 8 << 20), 48 << 20))

    cost = pl.CostEstimate(
        flops=int(B * HW * (4 * C + 4 * KH * KW)),
        transcendentals=int(B * HW),
        bytes_accessed=int(2 * B * C * HWp * itemsize),
    )

    out2 = pl.pallas_call(
        kernel,
        out_shape=jax.ShapeDtypeStruct((B, C, HWp), x.dtype),
        grid_spec=pltpu.PrefetchScalarGridSpec(
            num_scalar_prefetch=0,
            grid=(grid,),
            in_specs=[
                pl.BlockSpec(memory_space=pltpu.MemorySpace.SMEM),     # folded weight (98,)
                pl.BlockSpec(memory_space=pltpu.MemorySpace.SMEM),     # folded bias (1,)
                pl.BlockSpec((KW, HWp), lambda b: (0, 0)),             # column masks (resident)
                pl.BlockSpec((Bt, C, HWp), lambda b: (b, 0, 0)),       # input tile
            ],
            out_specs=pl.BlockSpec((Bt, C, HWp), lambda b: (b, 0, 0)),
            scratch_shapes=[pltpu.VMEM((2, Bt, L), jnp.float32)],
        ),
        compiler_params=pltpu.CompilerParams(
            dimension_semantics=("parallel",),
            vmem_limit_bytes=vmem_limit,
        ),
        cost_estimate=cost,
    )(w_folded, b_folded, col_masks, x2)

    if HWp != HW:
        out2 = out2[..., :HW]
    return out2.reshape(B, C, H, W)


def ref_forward(x, conv_w, gamma, beta, mean, var, eps=1e-5):
    """Pure-JAX reference reproducing the PyTorch forward (eval-mode BN)."""
    xmax = jnp.max(x, axis=1, keepdims=True)
    xmean = jnp.mean(x, axis=1, keepdims=True)
    xc = jnp.concatenate([xmax, xmean], axis=1)              # (B, 2, H, W)
    y = lax.conv_general_dilated(
        xc, conv_w, window_strides=(1, 1),
        padding=((PAD, PAD), (PAD, PAD)),
        dimension_numbers=("NCHW", "OIHW", "NCHW"))
    g = gamma.reshape(1, -1, 1, 1)
    b = beta.reshape(1, -1, 1, 1)
    m = mean.reshape(1, -1, 1, 1)
    v = var.reshape(1, -1, 1, 1)
    y = (y - m) / jnp.sqrt(v + eps) * g + b
    return x * jax.nn.sigmoid(y)


if __name__ == "__main__":
    key = jax.random.PRNGKey(0)
    kx, kw = jax.random.split(key)

    B, C, H, W = 2, 4, 16, 16
    x = jax.random.normal(kx, (B, C, H, W), dtype=jnp.float32)

    # Deterministic parameter init (shapes per module __init__):
    #   Conv2d(2, 1, kernel_size=7, padding=3, bias=False) -> weight (1, 2, 7, 7)
    #   BatchNorm2d(1, affine=True) -> PyTorch-default gamma=1, beta=0, running stats 0/1
    conv_w = jax.random.normal(kw, (1, 2, KH, KW), dtype=jnp.float32) * 0.05
    bn_gamma = jnp.ones((1,), jnp.float32)
    bn_beta = jnp.zeros((1,), jnp.float32)
    bn_mean = jnp.zeros((1,), jnp.float32)
    bn_var = jnp.ones((1,), jnp.float32)

    out = spatial_attention_block(x, conv_w, bn_gamma, bn_beta, bn_mean, bn_var)
    out = jax.block_until_ready(out)

    ref = ref_forward(x, conv_w, bn_gamma, bn_beta, bn_mean, bn_var)
    assert out.shape == (B, C, H, W)
    err = float(jnp.max(jnp.abs(out - ref)))
    assert jnp.allclose(out, ref, atol=1e-5, rtol=1e-5), f"max abs err = {err}"

    print("KERNEL_OK")
</pallas_src>

<mosaic_0001>
module attributes {stable_mosaic.version = 11 : i64} {
  func.func @kernel(%arg0: i32, %arg1: memref<98xf32, #tpu.memory_space<smem>>, %arg2: memref<1xf32, #tpu.memory_space<smem>>, %arg3: memref<7x256xf32, #tpu.memory_space<vmem>>, %arg4: memref<1x4x256xf32, #tpu.memory_space<vmem>>, %arg5: memref<1x4x256xf32, #tpu.memory_space<vmem>>, %arg6: memref<2x1x512xf32, #tpu.memory_space<vmem>>) attributes {dimension_semantics = [#tpu.dimension_semantics<parallel>], iteration_bounds = array<i64: 2>, scalar_prefetch = 0 : i64, scratch_operands = 1 : i64, tpu.core_type = #tpu.core_type<tc>, window_params = [{transform_indices = @transform_0, window_bounds = array<i64: 98>}, {transform_indices = @transform_1, window_bounds = array<i64: 1>}, {pipeline_mode = #tpu.pipeline_mode<synchronous>, transform_indices = @transform_2, window_bounds = array<i64: 7, 256>}, {transform_indices = @transform_3, window_bounds = array<i64: 1, 4, 256>}, {transform_indices = @transform_4, window_bounds = array<i64: 1, 4, 256>}]} {
    %cst = arith.constant 0.000000e+00 : f32
    %0 = vector.broadcast %cst : f32 to vector<2x1x128xf32>
    %c0 = arith.constant 0 : index
    %c0_0 = arith.constant 0 : index
    %c0_1 = arith.constant 0 : index
    %1 = vector.load %arg6[%c0, %c0_0, %c0_1] : memref<2x1x512xf32, #tpu.memory_space<vmem>>, vector<2x1x128xf32>
    tpu.vector_store %arg6[%c0, %c0_0, %c0_1], %0 {strides = array<i32>} : memref<2x1x512xf32, #tpu.memory_space<vmem>>, vector<2x1x128xf32>,
    %cst_2 = arith.constant 0.000000e+00 : f32
    %2 = vector.broadcast %cst_2 : f32 to vector<2x1x128xf32>
    %c0_3 = arith.constant 0 : index
    %c0_4 = arith.constant 0 : index
    %c384 = arith.constant 384 : index
    %3 = vector.load %arg6[%c0_3, %c0_4, %c384] : memref<2x1x512xf32, #tpu.memory_space<vmem>>, vector<2x1x128xf32>
    tpu.vector_store %arg6[%c0_3, %c0_4, %c384], %2 {strides = array<i32>} : memref<2x1x512xf32, #tpu.memory_space<vmem>>, vector<2x1x128xf32>,
    %c0_5 = arith.constant 0 : index
    %c0_6 = arith.constant 0 : index
    %c0_7 = arith.constant 0 : index
    %4 = vector.load %arg4[%c0_5, %c0_6, %c0_7] : memref<1x4x256xf32, #tpu.memory_space<vmem>>, vector<1x4x256xf32>
    %cst_8 = arith.constant dense<0xFF800000> : vector<1x256xf32>
    %5 = vector.multi_reduction <maximumf>, %4, %cst_8 [1] : vector<1x4x256xf32> to vector<1x256xf32>
    %cst_9 = arith.constant dense<0.000000e+00> : vector<1x256xf32>
    %6 = vector.multi_reduction <add>, %4, %cst_9 [1] : vector<1x4x256xf32> to vector<1x256xf32>
    %cst_10 = arith.constant 2.500000e-01 : f32
    %7 = vector.broadcast %cst_10 : f32 to vector<1x256xf32>
    %8 = arith.mulf %6, %7 : vector<1x256xf32>
    %c0_11 = arith.constant 0 : index
    %c0_12 = arith.constant 0 : index
    %c128 = arith.constant 128 : index
    %9 = vector.load %arg6[%c0_11, %c0_12, %c128] : memref<2x1x512xf32, #tpu.memory_space<vmem>>, vector<1x1x256xf32>
    %10 = vector.shape_cast %9 : vector<1x1x256xf32> to vector<1x256xf32>
    %11 = vector.shape_cast %5 : vector<1x256xf32> to vector<1x1x256xf32>
    tpu.vector_store %arg6[%c0_11, %c0_12, %c128], %11 {strides = array<i32>} : memref<2x1x512xf32, #tpu.memory_space<vmem>>, vector<1x1x256xf32>,
    %c1 = arith.constant 1 : index
    %c0_13 = arith.constant 0 : index
    %c128_14 = arith.constant 128 : index
    %12 = vector.load %arg6[%c1, %c0_13, %c128_14] : memref<2x1x512xf32, #tpu.memory_space<vmem>>, vector<1x1x256xf32>
    %13 = vector.shape_cast %12 : vector<1x1x256xf32> to vector<1x256xf32>
    %14 = vector.shape_cast %8 : vector<1x256xf32> to vector<1x1x256xf32>
    tpu.vector_store %arg6[%c1, %c0_13, %c128_14], %14 {strides = array<i32>} : memref<2x1x512xf32, #tpu.memory_space<vmem>>, vector<1x1x256xf32>,
    %c0_15 = arith.constant 0 : index
    %c0_16 = arith.constant 0 : index
    %15 = vector.load %arg3[%c0_15, %c0_16] : memref<7x256xf32, #tpu.memory_space<vmem>>, vector<7x256xf32>
    %c0_17 = arith.constant 0 : index
    %16 = memref.load %arg2[%c0_17] : memref<1xf32, #tpu.memory_space<smem>>
    %17 = vector.broadcast %16 : f32 to vector<1x256xf32>
    %c0_18 = arith.constant 0 : index
    %c0_19 = arith.constant 0 : index
    %c77 = arith.constant 77 : index
    %18 = vector.load %arg6[%c0_18, %c0_19, %c77] : memref<2x1x512xf32, #tpu.memory_space<vmem>>, vector<2x1x256xf32>
    %c0_20 = arith.constant 0 : index
    %19 = memref.load %arg1[%c0_20] : memref<98xf32, #tpu.memory_space<smem>>
    %20 = vector.extract_strided_slice %18 {offsets = [0, 0, 0], sizes = [1, 1, 256], strides = [1, 1, 1]} : vector<2x1x256xf32> to vector<1x1x256xf32>
    %21 = vector.shape_cast %20 : vector<1x1x256xf32> to vector<1x256xf32>
    %22 = vector.broadcast %19 : f32 to vector<1x256xf32>
    %23 = arith.mulf %22, %21 : vector<1x256xf32>
    %c49 = arith.constant 49 : index
    %24 = memref.load %arg1[%c49] : memref<98xf32, #tpu.memory_space<smem>>
    %25 = vector.extract_strided_slice %18 {offsets = [1, 0, 0], sizes = [1, 1, 256], strides = [1, 1, 1]} : vector<2x1x256xf32> to vector<1x1x256xf32>
    %26 = vector.shape_cast %25 : vector<1x1x256xf32> to vector<1x256xf32>
    %27 = vector.broadcast %24 : f32 to vector<1x256xf32>
    %28 = arith.mulf %27, %26 : vector<1x256xf32>
    %29 = arith.addf %23, %28 : vector<1x256xf32>
    %c0_21 = arith.constant 0 : index
    %c0_22 = arith.constant 0 : index
    %c93 = arith.constant 93 : index
    %30 = vector.load %arg6[%c0_21, %c0_22, %c93] : memref<2x1x512xf32, #tpu.memory_space<vmem>>, vector<2x1x256xf32>
    %c7 = arith.constant 7 : index
    %31 = memref.load %arg1[%c7] : memref<98xf32, #tpu.memory_space<smem>>
    %32 = vector.extract_strided_slice %30 {offsets = [0, 0, 0], sizes = [1, 1, 256], strides = [1, 1, 1]} : vector<2x1x256xf32> to vector<1x1x256xf32>
    %33 = vector.shape_cast %32 : vector<1x1x256xf32> to vector<1x256xf32>
    %34 = vector.broadcast %31 : f32 to vector<1x256xf32>
    %35 = arith.mulf %34, %33 : vector<1x256xf32>
    %c56 = arith.constant 56 : index
    %36 = memref.load %arg1[%c56] : memref<98xf32, #tpu.memory_space<smem>>
    %37 = vector.extract_strided_slice %30 {offsets = [1, 0, 0], sizes = [1, 1, 256], strides = [1, 1, 1]} : vector<2x1x256xf32> to vector<1x1x256xf32>
    %38 = vector.shape_cast %37 : vector<1x1x256xf32> to vector<1x256xf32>
    %39 = vector.broadcast %36 : f32 to vector<1x256xf32>
    %40 = arith.mulf %39, %38 : vector<1x256xf32>
    %41 = arith.addf %35, %40 : vector<1x256xf32>
    %42 = arith.addf %29, %41 : vector<1x256xf32>
    %c0_23 = arith.constant 0 : index
    %c0_24 = arith.constant 0 : index
    %c109 = arith.constant 109 : index
    %43 = vector.load %arg6[%c0_23, %c0_24, %c109] : memref<2x1x512xf32, #tpu.memory_space<vmem>>, vector<2x1x256xf32>
    %c14 = arith.constant 14 : index
    %44 = memref.load %arg1[%c14] : memref<98xf32, #tpu.memory_space<smem>>
    %45 = vector.extract_strided_slice %43 {offsets = [0, 0, 0], sizes = [1, 1, 256], strides = [1, 1, 1]} : vector<2x1x256xf32> to vector<1x1x256xf32>
    %46 = vector.shape_cast %45 : vector<1x1x256xf32> to vector<1x256xf32>
    %47 = vector.broadcast %44 : f32 to vector<1x256xf32>
    %48 = arith.mulf %47, %46 : vector<1x256xf32>
    %c63 = arith.constant 63 : index
    %49 = memref.load %arg1[%c63] : memref<98xf32, #tpu.memory_space<smem>>
    %50 = vector.extract_strided_slice %43 {offsets = [1, 0, 0], sizes = [1, 1, 256], strides = [1, 1, 1]} : vector<2x1x256xf32> to vector<1x1x256xf32>
    %51 = vector.shape_cast %50 : vector<1x1x256xf32> to vector<1x256xf32>
    %52 = vector.broadcast %49 : f32 to vector<1x256xf32>
    %53 = arith.mulf %52, %51 : vector<1x256xf32>
    %54 = arith.addf %48, %53 : vector<1x256xf32>
    %55 = arith.addf %42, %54 : vector<1x256xf32>
    %c0_25 = arith.constant 0 : index
    %c0_26 = arith.constant 0 : index
    %c125 = arith.constant 125 : index
    %56 = vector.load %arg6[%c0_25, %c0_26, %c125] : memref<2x1x512xf32, #tpu.memory_space<vmem>>, vector<2x1x256xf32>
    %c21 = arith.constant 21 : index
    %57 = memref.load %arg1[%c21] : memref<98xf32, #tpu.memory_space<smem>>
    %58 = vector.extract_strided_slice %56 {offsets = [0, 0, 0], sizes = [1, 1, 256], strides = [1, 1, 1]} : vector<2x1x256xf32> to vector<1x1x256xf32>
    %59 = vector.shape_cast %58 : vector<1x1x256xf32> to vector<1x256xf32>
    %60 = vector.broadcast %57 : f32 to vector<1x256xf32>
    %61 = arith.mulf %60, %59 : vector<1x256xf32>
    %c70 = arith.constant 70 : index
    %62 = memref.load %arg1[%c70] : memref<98xf32, #tpu.memory_space<smem>>
    %63 = vector.extract_strided_slice %56 {offsets = [1, 0, 0], sizes = [1, 1, 256], strides = [1, 1, 1]} : vector<2x1x256xf32> to vector<1x1x256xf32>
    %64 = vector.shape_cast %63 : vector<1x1x256xf32> to vector<1x256xf32>
    %65 = vector.broadcast %62 : f32 to vector<1x256xf32>
    %66 = arith.mulf %65, %64 : vector<1x256xf32>
    %67 = arith.addf %61, %66 : vector<1x256xf32>
    %68 = arith.addf %55, %67 : vector<1x256xf32>
    %c0_27 = arith.constant 0 : index
    %c0_28 = arith.constant 0 : index
    %c141 = arith.constant 141 : index
    %69 = vector.load %arg6[%c0_27, %c0_28, %c141] : memref<2x1x512xf32, #tpu.memory_space<vmem>>, vector<2x1x256xf32>
    %c28 = arith.constant 28 : index
    %70 = memref.load %arg1[%c28] : memref<98xf32, #tpu.memory_space<smem>>
    %71 = vector.extract_strided_slice %69 {offsets = [0, 0, 0], sizes = [1, 1, 256], strides = [1, 1, 1]} : vector<2x1x256xf32> to vector<1x1x256xf32>
    %72 = vector.shape_cast %71 : vector<1x1x256xf32> to vector<1x256xf32>
    %73 = vector.broadcast %70 : f32 to vector<1x256xf32>
    %74 = arith.mulf %73, %72 : vector<1x256xf32>
    %c77_29 = arith.constant 77 : index
    %75 = memref.load %arg1[%c77_29] : memref<98xf32, #tpu.memory_space<smem>>
    %76 = vector.extract_strided_slice %69 {offsets = [1, 0, 0], sizes = [1, 1, 256], strides = [1, 1, 1]} : vector<2x1x256xf32> to vector<1x1x256xf32>
    %77 = vector.shape_cast %76 : vector<1x1x256xf32> to vector<1x256xf32>
    %78 = vector.broadcast %75 : f32 to vector<1x256xf32>
    %79 = arith.mulf %78, %77 : vector<1x256xf32>
    %80 = arith.addf %74, %79 : vector<1x256xf32>
    %81 = arith.addf %68, %80 : vector<1x256xf32>
    %c0_30 = arith.constant 0 : index
    %c0_31 = arith.constant 0 : index
    %c157 = arith.constant 157 : index
    %82 = vector.load %arg6[%c0_30, %c0_31, %c157] : memref<2x1x512xf32, #tpu.memory_space<vmem>>, vector<2x1x256xf32>
    %c35 = arith.constant 35 : index
    %83 = memref.load %arg1[%c35] : memref<98xf32, #tpu.memory_space<smem>>
    %84 = vector.extract_strided_slice %82 {offsets = [0, 0, 0], sizes = [1, 1, 256], strides = [1, 1, 1]} : vector<2x1x256xf32> to vector<1x1x256xf32>
    %85 = vector.shape_cast %84 : vector<1x1x256xf32> to vector<1x256xf32>
    %86 = vector.broadcast %83 : f32 to vector<1x256xf32>
    %87 = arith.mulf %86, %85 : vector<1x256xf32>
    %c84 = arith.constant 84 : index
    %88 = memref.load %arg1[%c84] : memref<98xf32, #tpu.memory_space<smem>>
    %89 = vector.extract_strided_slice %82 {offsets = [1, 0, 0], sizes = [1, 1, 256], strides = [1, 1, 1]} : vector<2x1x256xf32> to vector<1x1x256xf32>
    %90 = vector.shape_cast %89 : vector<1x1x256xf32> to vector<1x256xf32>
    %91 = vector.broadcast %88 : f32 to vector<1x256xf32>
    %92 = arith.mulf %91, %90 : vector<1x256xf32>
    %93 = arith.addf %87, %92 : vector<1x256xf32>
    %94 = arith.addf %81, %93 : vector<1x256xf32>
    %c0_32 = arith.constant 0 : index
    %c0_33 = arith.constant 0 : index
    %c173 = arith.constant 173 : index
    %95 = vector.load %arg6[%c0_32, %c0_33, %c173] : memref<2x1x512xf32, #tpu.memory_space<vmem>>, vector<2x1x256xf32>
    %c42 = arith.constant 42 : index
    %96 = memref.load %arg1[%c42] : memref<98xf32, #tpu.memory_space<smem>>
    %97 = vector.extract_strided_slice %95 {offsets = [0, 0, 0], sizes = [1, 1, 256], strides = [1, 1, 1]} : vector<2x1x256xf32> to vector<1x1x256xf32>
    %98 = vector.shape_cast %97 : vector<1x1x256xf32> to vector<1x256xf32>
    %99 = vector.broadcast %96 : f32 to vector<1x256xf32>
    %100 = arith.mulf %99, %98 : vector<1x256xf32>
    %c91 = arith.constant 91 : index
    %101 = memref.load %arg1[%c91] : memref<98xf32, #tpu.memory_space<smem>>
    %102 = vector.extract_strided_slice %95 {offsets = [1, 0, 0], sizes = [1, 1, 256], strides = [1, 1, 1]} : vector<2x1x256xf32> to vector<1x1x256xf32>
    %103 = vector.shape_cast %102 : vector<1x1x256xf32> to vector<1x256xf32>
    %104 = vector.broadcast %101 : f32 to vector<1x256xf32>
    %105 = arith.mulf %104, %103 : vector<1x256xf32>
    %106 = arith.addf %100, %105 : vector<1x256xf32>
    %107 = arith.addf %94, %106 : vector<1x256xf32>
    %108 = vector.extract_strided_slice %15 {offsets = [0, 0], sizes = [1, 256], strides = [1, 1]} : vector<7x256xf32> to vector<1x256xf32>
    %109 = arith.mulf %107, %108 : vector<1x256xf32>
    %110 = arith.addf %17, %109 : vector<1x256xf32>
    %c0_34 = arith.constant 0 : index
    %c0_35 = arith.constant 0 : index
    %c78 = arith.constant 78 : index
    %111 = vector.load %arg6[%c0_34, %c0_35, %c78] : memref<2x1x512xf32, #tpu.memory_space<vmem>>, vector<2x1x256xf32>
    %c1_36 = arith.constant 1 : index
    %112 = memref.load %arg1[%c1_36] : memref<98xf32, #tpu.memory_space<smem>>
    %113 = vector.extract_strided_slice %111 {offsets = [0, 0, 0], sizes = [1, 1, 256], strides = [1, 1, 1]} : vector<2x1x256xf32> to vector<1x1x256xf32>
    %114 = vector.shape_cast %113 : vector<1x1x256xf32> to vector<1x256xf32>
    %115 = vector.broadcast %112 : f32 to vector<1x256xf32>
    %116 = arith.mulf %115, %114 : vector<1x256xf32>
    %c50 = arith.constant 50 : index
    %117 = memref.load %arg1[%c50] : memref<98xf32, #tpu.memory_space<smem>>
    %118 = vector.extract_strided_slice %111 {offsets = [1, 0, 0], sizes = [1, 1, 256], strides = [1, 1, 1]} : vector<2x1x256xf32> to vector<1x1x256xf32>
    %119 = vector.shape_cast %118 : vector<1x1x256xf32> to vector<1x256xf32>
    %120 = vector.broadcast %117 : f32 to vector<1x256xf32>
    %121 = arith.mulf %120, %119 : vector<1x256xf32>
    %122 = arith.addf %116, %121 : vector<1x256xf32>
    %c0_37 = arith.constant 0 : index
    %c0_38 = arith.constant 0 : index
    %c94 = arith.constant 94 : index
    %123 = vector.load %arg6[%c0_37, %c0_38, %c94] : memref<2x1x512xf32, #tpu.memory_space<vmem>>, vector<2x1x256xf32>
    %c8 = arith.constant 8 : index
    %124 = memref.load %arg1[%c8] : memref<98xf32, #tpu.memory_space<smem>>
    %125 = vector.extract_strided_slice %123 {offsets = [0, 0, 0], sizes = [1, 1, 256], strides = [1, 1, 1]} : vector<2x1x256xf32> to vector<1x1x256xf32>
    %126 = vector.shape_cast %125 : vector<1x1x256xf32> to vector<1x256xf32>
    %127 = vector.broadcast %124 : f32 to vector<1x256xf32>
    %128 = arith.mulf %127, %126 : vector<1x256xf32>
    %c57 = arith.constant 57 : index
    %129 = memref.load %arg1[%c57] : memref<98xf32, #tpu.memory_space<smem>>
    %130 = vector.extract_strided_slice %123 {offsets = [1, 0, 0], sizes = [1, 1, 256], strides = [1, 1, 1]} : vector<2x1x256xf32> to vector<1x1x256xf32>
    %131 = vector.shape_cast %130 : vector<1x1x256xf32> to vector<1x256xf32>
    %132 = vector.broadcast %129 : f32 to vector<1x256xf32>
    %133 = arith.mulf %132, %131 : vector<1x256xf32>
    %134 = arith.addf %128, %133 : vector<1x256xf32>
    %135 = arith.addf %122, %134 : vector<1x256xf32>
    %c0_39 = arith.constant 0 : index
    %c0_40 = arith.constant 0 : index
    %c110 = arith.constant 110 : index
    %136 = vector.load %arg6[%c0_39, %c0_40, %c110] : memref<2x1x512xf32, #tpu.memory_space<vmem>>, vector<2x1x256xf32>
    %c15 = arith.constant 15 : index
    %137 = memref.load %arg1[%c15] : memref<98xf32, #tpu.memory_space<smem>>
    %138 = vector.extract_strided_slice %136 {offsets = [0, 0, 0], sizes = [1, 1, 256], strides = [1, 1, 1]} : vector<2x1x256xf32> to vector<1x1x256xf32>
    %139 = vector.shape_cast %138 : vector<1x1x256xf32> to vector<1x256xf32>
    %140 = vector.broadcast %137 : f32 to vector<1x256xf32>
    %141 = arith.mulf %140, %139 : vector<1x256xf32>
    %c64 = arith.constant 64 : index
    %142 = memref.load %arg1[%c64] : memref<98xf32, #tpu.memory_space<smem>>
    %143 = vector.extract_strided_slice %136 {offsets = [1, 0, 0], sizes = [1, 1, 256], strides = [1, 1, 1]} : vector<2x1x256xf32> to vector<1x1x256xf32>
    %144 = vector.shape_cast %143 : vector<1x1x256xf32> to vector<1x256xf32>
    %145 = vector.broadcast %142 : f32 to vector<1x256xf32>
    %146 = arith.mulf %145, %144 : vector<1x256xf32>
    %147 = arith.addf %141, %146 : vector<1x256xf32>
    %148 = arith.addf %135, %147 : vector<1x256xf32>
    %c0_41 = arith.constant 0 : index
    %c0_42 = arith.constant 0 : index
    %c126 = arith.constant 126 : index
    %149 = vector.load %arg6[%c0_41, %c0_42, %c126] : memref<2x1x512xf32, #tpu.memory_space<vmem>>, vector<2x1x256xf32>
    %c22 = arith.constant 22 : index
    %150 = memref.load %arg1[%c22] : memref<98xf32, #tpu.memory_space<smem>>
    %151 = vector.extract_strided_slice %149 {offsets = [0, 0, 0], sizes = [1, 1, 256], strides = [1, 1, 1]} : vector<2x1x256xf32> to vector<1x1x256xf32>
    %152 = vector.shape_cast %151 : vector<1x1x256xf32> to vector<1x256xf32>
    %153 = vector.broadcast %150 : f32 to vector<1x256xf32>
    %154 = arith.mulf %153, %152 : vector<1x256xf32>
    %c71 = arith.constant 71 : index
    %155 = memref.load %arg1[%c71] : memref<98xf32, #tpu.memory_space<smem>>
    %156 = vector.extract_strided_slice %149 {offsets = [1, 0, 0], sizes = [1, 1, 256], strides = [1, 1, 1]} : vector<2x1x256xf32> to vector<1x1x256xf32>
    %157 = vector.shape_cast %156 : vector<1x1x256xf32> to vector<1x256xf32>
    %158 = vector.broadcast %155 : f32 to vector<1x256xf32>
    %159 = arith.mulf %158, %157 : vector<1x256xf32>
    %160 = arith.addf %154, %159 : vector<1x256xf32>
    %161 = arith.addf %148, %160 : vector<1x256xf32>
    %c0_43 = arith.constant 0 : index
    %c0_44 = arith.constant 0 : index
    %c142 = arith.constant 142 : index
    %162 = vector.load %arg6[%c0_43, %c0_44, %c142] : memref<2x1x512xf32, #tpu.memory_space<vmem>>, vector<2x1x256xf32>
    %c29 = arith.constant 29 : index
    %163 = memref.load %arg1[%c29] : memref<98xf32, #tpu.memory_space<smem>>
    %164 = vector.extract_strided_slice %162 {offsets = [0, 0, 0], sizes = [1, 1, 256], strides = [1, 1, 1]} : vector<2x1x256xf32> to vector<1x1x256xf32>
    %165 = vector.shape_cast %164 : vector<1x1x256xf32> to vector<1x256xf32>
    %166 = vector.broadcast %163 : f32 to vector<1x256xf32>
    %167 = arith.mulf %166, %165 : vector<1x256xf32>
    %c78_45 = arith.constant 78 : index
    %168 = memref.load %arg1[%c78_45] : memref<98xf32, #tpu.memory_space<smem>>
    %169 = vector.extract_strided_slice %162 {offsets = [1, 0, 0], sizes = [1, 1, 256], strides = [1, 1, 1]} : vector<2x1x256xf32> to vector<1x1x256xf32>
    %170 = vector.shape_cast %169 : vector<1x1x256xf32> to vector<1x256xf32>
    %171 = vector.broadcast %168 : f32 to vector<1x256xf32>
    %172 = arith.mulf %171, %170 : vector<1x256xf32>
    %173 = arith.addf %167, %172 : vector<1x256xf32>
    %174 = arith.addf %161, %173 : vector<1x256xf32>
    %c0_46 = arith.constant 0 : index
    %c0_47 = arith.constant 0 : index
    %c158 = arith.constant 158 : index
    %175 = vector.load %arg6[%c0_46, %c0_47, %c158] : memref<2x1x512xf32, #tpu.memory_space<vmem>>, vector<2x1x256xf32>
    %c36 = arith.constant 36 : index
    %176 = memref.load %arg1[%c36] : memref<98xf32, #tpu.memory_space<smem>>
    %177 = vector.extract_strided_slice %175 {offsets = [0, 0, 0], sizes = [1, 1, 256], strides = [1, 1, 1]} : vector<2x1x256xf32> to vector<1x1x256xf32>
    %178 = vector.shape_cast %177 : vector<1x1x256xf32> to vector<1x256xf32>
    %179 = vector.broadcast %176 : f32 to vector<1x256xf32>
    %180 = arith.mulf %179, %178 : vector<1x256xf32>
    %c85 = arith.constant 85 : index
    %181 = memref.load %arg1[%c85] : memref<98xf32, #tpu.memory_space<smem>>
    %182 = vector.extract_strided_slice %175 {offsets = [1, 0, 0], sizes = [1, 1, 256], strides = [1, 1, 1]} : vector<2x1x256xf32> to vector<1x1x256xf32>
    %183 = vector.shape_cast %182 : vector<1x1x256xf32> to vector<1x256xf32>
    %184 = vector.broadcast %181 : f32 to vector<1x256xf32>
    %185 = arith.mulf %184, %183 : vector<1x256xf32>
    %186 = arith.addf %180, %185 : vector<1x256xf32>
    %187 = arith.addf %174, %186 : vector<1x256xf32>
    %c0_48 = arith.constant 0 : index
    %c0_49 = arith.constant 0 : index
    %c174 = arith.constant 174 : index
    %188 = vector.load %arg6[%c0_48, %c0_49, %c174] : memref<2x1x512xf32, #tpu.memory_space<vmem>>, vector<2x1x256xf32>
    %c43 = arith.constant 43 : index
    %189 = memref.load %arg1[%c43] : memref<98xf32, #tpu.memory_space<smem>>
    %190 = vector.extract_strided_slice %188 {offsets = [0, 0, 0], sizes = [1, 1, 256], strides = [1, 1, 1]} : vector<2x1x256xf32> to vector<1x1x256xf32>
    %191 = vector.shape_cast %190 : vector<1x1x256xf32> to vector<1x256xf32>
    %192 = vector.broadcast %189 : f32 to vector<1x256xf32>
    %193 = arith.mulf %192, %191 : vector<1x256xf32>
    %c92 = arith.constant 92 : index
    %194 = memref.load %arg1[%c92] : memref<98xf32, #tpu.memory_space<smem>>
    %195 = vector.extract_strided_slice %188 {offsets = [1, 0, 0], sizes = [1, 1, 256], strides = [1, 1, 1]} : vector<2x1x256xf32> to vector<1x1x256xf32>
    %196 = vector.shape_cast %195 : vector<1x1x256xf32> to vector<1x256xf32>
    %197 = vector.broadcast %194 : f32 to vector<1x256xf32>
    %198 = arith.mulf %197, %196 : vector<1x256xf32>
    %199 = arith.addf %193, %198 : vector<1x256xf32>
    %200 = arith.addf %187, %199 : vector<1x256xf32>
    %201 = vector.extract_strided_slice %15 {offsets = [1, 0], sizes = [1, 256], strides = [1, 1]} : vector<7x256xf32> to vector<1x256xf32>
    %202 = arith.mulf %200, %201 : vector<1x256xf32>
    %203 = arith.addf %110, %202 : vector<1x256xf32>
    %c0_50 = arith.constant 0 : index
    %c0_51 = arith.constant 0 : index
    %c79 = arith.constant 79 : index
    %204 = vector.load %arg6[%c0_50, %c0_51, %c79] : memref<2x1x512xf32, #tpu.memory_space<vmem>>, vector<2x1x256xf32>
    %c2 = arith.constant 2 : index
    %205 = memref.load %arg1[%c2] : memref<98xf32, #tpu.memory_space<smem>>
    %206 = vector.extract_strided_slice %204 {offsets = [0, 0, 0], sizes = [1, 1, 256], strides = [1, 1, 1]} : vector<2x1x256xf32> to vector<1x1x256xf32>
    %207 = vector.shape_cast %206 : vector<1x1x256xf32> to vector<1x256xf32>
    %208 = vector.broadcast %205 : f32 to vector<1x256xf32>
    %209 = arith.mulf %208, %207 : vector<1x256xf32>
    %c51 = arith.constant 51 : index
    %210 = memref.load %arg1[%c51] : memref<98xf32, #tpu.memory_space<smem>>
    %211 = vector.extract_strided_slice %204 {offsets = [1, 0, 0], sizes = [1, 1, 256], strides = [1, 1, 1]} : vector<2x1x256xf32> to vector<1x1x256xf32>
    %212 = vector.shape_cast %211 : vector<1x1x256xf32> to vector<1x256xf32>
    %213 = vector.broadcast %210 : f32 to vector<1x256xf32>
    %214 = arith.mulf %213, %212 : vector<1x256xf32>
    %215 = arith.addf %209, %214 : vector<1x256xf32>
    %c0_52 = arith.constant 0 : index
    %c0_53 = arith.constant 0 : index
    %c95 = arith.constant 95 : index
    %216 = vector.load %arg6[%c0_52, %c0_53, %c95] : memref<2x1x512xf32, #tpu.memory_space<vmem>>, vector<2x1x256xf32>
    %c9 = arith.constant 9 : index
    %217 = memref.load %arg1[%c9] : memref<98xf32, #tpu.memory_space<smem>>
    %218 = vector.extract_strided_slice %216 {offsets = [0, 0, 0], sizes = [1, 1, 256], strides = [1, 1, 1]} : vector<2x1x256xf32> to vector<1x1x256xf32>
    %219 = vector.shape_cast %218 : vector<1x1x256xf32> to vector<1x256xf32>
    %220 = vector.broadcast %217 : f32 to vector<1x256xf32>
    %221 = arith.mulf %220, %219 : vector<1x256xf32>
    %c58 = arith.constant 58 : index
    %222 = memref.load %arg1[%c58] : memref<98xf32, #tpu.memory_space<smem>>
    %223 = vector.extract_strided_slice %216 {offsets = [1, 0, 0], sizes = [1, 1, 256], strides = [1, 1, 1]} : vector<2x1x256xf32> to vector<1x1x256xf32>
    %224 = vector.shape_cast %223 : vector<1x1x256xf32> to vector<1x256xf32>
    %225 = vector.broadcast %222 : f32 to vector<1x256xf32>
    %226 = arith.mulf %225, %224 : vector<1x256xf32>
    %227 = arith.addf %221, %226 : vector<1x256xf32>
    %228 = arith.addf %215, %227 : vector<1x256xf32>
    %c0_54 = arith.constant 0 : index
    %c0_55 = arith.constant 0 : index
    %c111 = arith.constant 111 : index
    %229 = vector.load %arg6[%c0_54, %c0_55, %c111] : memref<2x1x512xf32, #tpu.memory_space<vmem>>, vector<2x1x256xf32>
    %c16 = arith.constant 16 : index
    %230 = memref.load %arg1[%c16] : memref<98xf32, #tpu.memory_space<smem>>
    %231 = vector.extract_strided_slice %229 {offsets = [0, 0, 0], sizes = [1, 1, 256], strides = [1, 1, 1]} : vector<2x1x256xf32> to vector<1x1x256xf32>
    %232 = vector.shape_cast %231 : vector<1x1x256xf32> to vector<1x256xf32>
    %233 = vector.broadcast %230 : f32 to vector<1x256xf32>
    %234 = arith.mulf %233, %232 : vector<1x256xf32>
    %c65 = arith.constant 65 : index
    %235 = memref.load %arg1[%c65] : memref<98xf32, #tpu.memory_space<smem>>
    %236 = vector.extract_strided_slice %229 {offsets = [1, 0, 0], sizes = [1, 1, 256], strides = [1, 1, 1]} : vector<2x1x256xf32> to vector<1x1x256xf32>
    %237 = vector.shape_cast %236 : vector<1x1x256xf32> to vector<1x256xf32>
    %238 = vector.broadcast %235 : f32 to vector<1x256xf32>
    %239 = arith.mulf %238, %237 : vector<1x256xf32>
    %240 = arith.addf %234, %239 : vector<1x256xf32>
    %241 = arith.addf %228, %240 : vector<1x256xf32>
    %c0_56 = arith.constant 0 : index
    %c0_57 = arith.constant 0 : index
    %c127 = arith.constant 127 : index
    %242 = vector.load %arg6[%c0_56, %c0_57, %c127] : memref<2x1x512xf32, #tpu.memory_space<vmem>>, vector<2x1x256xf32>
    %c23 = arith.constant 23 : index
    %243 = memref.load %arg1[%c23] : memref<98xf32, #tpu.memory_space<smem>>
    %244 = vector.extract_strided_slice %242 {offsets = [0, 0, 0], sizes = [1, 1, 256], strides = [1, 1, 1]} : vector<2x1x256xf32> to vector<1x1x256xf32>
    %245 = vector.shape_cast %244 : vector<1x1x256xf32> to vector<1x256xf32>
    %246 = vector.broadcast %243 : f32 to vector<1x256xf32>
    %247 = arith.mulf %246, %245 : vector<1x256xf32>
    %c72 = arith.constant 72 : index
    %248 = memref.load %arg1[%c72] : memref<98xf32, #tpu.memory_space<smem>>
    %249 = vector.extract_strided_slice %242 {offsets = [1, 0, 0], sizes = [1, 1, 256], strides = [1, 1, 1]} : vector<2x1x256xf32> to vector<1x1x256xf32>
    %250 = vector.shape_cast %249 : vector<1x1x256xf32> to vector<1x256xf32>
    %251 = vector.broadcast %248 : f32 to vector<1x256xf32>
    %252 = arith.mulf %251, %250 : vector<1x256xf32>
    %253 = arith.addf %247, %252 : vector<1x256xf32>
    %254 = arith.addf %241, %253 : vector<1x256xf32>
    %c0_58 = arith.constant 0 : index
    %c0_59 = arith.constant 0 : index
    %c143 = arith.constant 143 : index
    %255 = vector.load %arg6[%c0_58, %c0_59, %c143] : memref<2x1x512xf32, #tpu.memory_space<vmem>>, vector<2x1x256xf32>
    %c30 = arith.constant 30 : index
    %256 = memref.load %arg1[%c30] : memref<98xf32, #tpu.memory_space<smem>>
    %257 = vector.extract_strided_slice %255 {offsets = [0, 0, 0], sizes = [1, 1, 256], strides = [1, 1, 1]} : vector<2x1x256xf32> to vector<1x1x256xf32>
    %258 = vector.shape_cast %257 : vector<1x1x256xf32> to vector<1x256xf32>
    %259 = vector.broadcast %256 : f32 to vector<1x256xf32>
    %260 = arith.mulf %259, %258 : vector<1x256xf32>
    %c79_60 = arith.constant 79 : index
    %261 = memref.load %arg1[%c79_60] : memref<98xf32, #tpu.memory_space<smem>>
    %262 = vector.extract_strided_slice %255 {offsets = [1, 0, 0], sizes = [1, 1, 256], strides = [1, 1, 1]} : vector<2x1x256xf32> to vector<1x1x256xf32>
    %263 = vector.shape_cast %262 : vector<1x1x256xf32> to vector<1x256xf32>
    %264 = vector.broadcast %261 : f32 to vector<1x256xf32>
    %265 = arith.mulf %264, %263 : vector<1x256xf32>
    %266 = arith.addf %260, %265 : vector<1x256xf32>
    %267 = arith.addf %254, %266 : vector<1x256xf32>
    %c0_61 = arith.constant 0 : index
    %c0_62 = arith.constant 0 : index
    %c159 = arith.constant 159 : index
    %268 = vector.load %arg6[%c0_61, %c0_62, %c159] : memref<2x1x512xf32, #tpu.memory_space<vmem>>, vector<2x1x256xf32>
    %c37 = arith.constant 37 : index
    %269 = memref.load %arg1[%c37] : memref<98xf32, #tpu.memory_space<smem>>
    %270 = vector.extract_strided_slice %268 {offsets = [0, 0, 0], sizes = [1, 1, 256], strides = [1, 1, 1]} : vector<2x1x256xf32> to vector<1x1x256xf32>
    %271 = vector.shape_cast %270 : vector<1x1x256xf32> to vector<1x256xf32>
    %272 = vector.broadcast %269 : f32 to vector<1x256xf32>
    %273 = arith.mulf %272, %271 : vector<1x256xf32>
    %c86 = arith.constant 86 : index
    %274 = memref.load %arg1[%c86] : memref<98xf32, #tpu.memory_space<smem>>
    %275 = vector.extract_strided_slice %268 {offsets = [1, 0, 0], sizes = [1, 1, 256], strides = [1, 1, 1]} : vector<2x1x256xf32> to vector<1x1x256xf32>
    %276 = vector.shape_cast %275 : vector<1x1x256xf32> to vector<1x256xf32>
    %277 = vector.broadcast %274 : f32 to vector<1x256xf32>
    %278 = arith.mulf %277, %276 : vector<1x256xf32>
    %279 = arith.addf %273, %278 : vector<1x256xf32>
    %280 = arith.addf %267, %279 : vector<1x256xf32>
    %c0_63 = arith.constant 0 : index
    %c0_64 = arith.constant 0 : index
    %c175 = arith.constant 175 : index
    %281 = vector.load %arg6[%c0_63, %c0_64, %c175] : memref<2x1x512xf32, #tpu.memory_space<vmem>>, vector<2x1x256xf32>
    %c44 = arith.constant 44 : index
    %282 = memref.load %arg1[%c44] : memref<98xf32, #tpu.memory_space<smem>>
    %283 = vector.extract_strided_slice %281 {offsets = [0, 0, 0], sizes = [1, 1, 256], strides = [1, 1, 1]} : vector<2x1x256xf32> to vector<1x1x256xf32>
    %284 = vector.shape_cast %283 : vector<1x1x256xf32> to vector<1x256xf32>
    %285 = vector.broadcast %282 : f32 to vector<1x256xf32>
    %286 = arith.mulf %285, %284 : vector<1x256xf32>
    %c93_65 = arith.constant 93 : index
    %287 = memref.load %arg1[%c93_65] : memref<98xf32, #tpu.memory_space<smem>>
    %288 = vector.extract_strided_slice %281 {offsets = [1, 0, 0], sizes = [1, 1, 256], strides = [1, 1, 1]} : vector<2x1x256xf32> to vector<1x1x256xf32>
    %289 = vector.shape_cast %288 : vector<1x1x256xf32> to vector<1x256xf32>
    %290 = vector.broadcast %287 : f32 to vector<1x256xf32>
    %291 = arith.mulf %290, %289 : vector<1x256xf32>
    %292 = arith.addf %286, %291 : vector<1x256xf32>
    %293 = arith.addf %280, %292 : vector<1x256xf32>
    %294 = vector.extract_strided_slice %15 {offsets = [2, 0], sizes = [1, 256], strides = [1, 1]} : vector<7x256xf32> to vector<1x256xf32>
    %295 = arith.mulf %293, %294 : vector<1x256xf32>
    %296 = arith.addf %203, %295 : vector<1x256xf32>
    %c0_66 = arith.constant 0 : index
    %c0_67 = arith.constant 0 : index
    %c80 = arith.constant 80 : index
    %297 = vector.load %arg6[%c0_66, %c0_67, %c80] : memref<2x1x512xf32, #tpu.memory_space<vmem>>, vector<2x1x256xf32>
    %c3 = arith.constant 3 : index
    %298 = memref.load %arg1[%c3] : memref<98xf32, #tpu.memory_space<smem>>
    %299 = vector.extract_strided_slice %297 {offsets = [0, 0, 0], sizes = [1, 1, 256], strides = [1, 1, 1]} : vector<2x1x256xf32> to vector<1x1x256xf32>
    %300 = vector.shape_cast %299 : vector<1x1x256xf32> to vector<1x256xf32>
    %301 = vector.broadcast %298 : f32 to vector<1x256xf32>
    %302 = arith.mulf %301, %300 : vector<1x256xf32>
    %c52 = arith.constant 52 : index
    %303 = memref.load %arg1[%c52] : memref<98xf32, #tpu.memory_space<smem>>
    %304 = vector.extract_strided_slice %297 {offsets = [1, 0, 0], sizes = [1, 1, 256], strides = [1, 1, 1]} : vector<2x1x256xf32> to vector<1x1x256xf32>
    %305 = vector.shape_cast %304 : vector<1x1x256xf32> to vector<1x256xf32>
    %306 = vector.broadcast %303 : f32 to vector<1x256xf32>
    %307 = arith.mulf %306, %305 : vector<1x256xf32>
    %308 = arith.addf %302, %307 : vector<1x256xf32>
    %c0_68 = arith.constant 0 : index
    %c0_69 = arith.constant 0 : index
    %c96 = arith.constant 96 : index
    %309 = vector.load %arg6[%c0_68, %c0_69, %c96] : memref<2x1x512xf32, #tpu.memory_space<vmem>>, vector<2x1x256xf32>
    %c10 = arith.constant 10 : index
    %310 = memref.load %arg1[%c10] : memref<98xf32, #tpu.memory_space<smem>>
    %311 = vector.extract_strided_slice %309 {offsets = [0, 0, 0], sizes = [1, 1, 256], strides = [1, 1, 1]} : vector<2x1x256xf32> to vector<1x1x256xf32>
    %312 = vector.shape_cast %311 : vector<1x1x256xf32> to vector<1x256xf32>
    %313 = vector.broadcast %310 : f32 to vector<1x256xf32>
    %314 = arith.mulf %313, %312 : vector<1x256xf32>
    %c59 = arith.constant 59 : index
    %315 = memref.load %arg1[%c59] : memref<98xf32, #tpu.memory_space<smem>>
    %316 = vector.extract_strided_slice %309 {offsets = [1, 0, 0], sizes = [1, 1, 256], strides = [1, 1, 1]} : vector<2x1x256xf32> to vector<1x1x256xf32>
    %317 = vector.shape_cast %316 : vector<1x1x256xf32> to vector<1x256xf32>
    %318 = vector.broadcast %315 : f32 to vector<1x256xf32>
    %319 = arith.mulf %318, %317 : vector<1x256xf32>
    %320 = arith.addf %314, %319 : vector<1x256xf32>
    %321 = arith.addf %308, %320 : vector<1x256xf32>
    %c0_70 = arith.constant 0 : index
    %c0_71 = arith.constant 0 : index
    %c112 = arith.constant 112 : index
    %322 = vector.load %arg6[%c0_70, %c0_71, %c112] : memref<2x1x512xf32, #tpu.memory_space<vmem>>, vector<2x1x256xf32>
    %c17 = arith.constant 17 : index
    %323 = memref.load %arg1[%c17] : memref<98xf32, #tpu.memory_space<smem>>
    %324 = vector.extract_strided_slice %322 {offsets = [0, 0, 0], sizes = [1, 1, 256], strides = [1, 1, 1]} : vector<2x1x256xf32> to vector<1x1x256xf32>
    %325 = vector.shape_cast %324 : vector<1x1x256xf32> to vector<1x256xf32>
    %326 = vector.broadcast %323 : f32 to vector<1x256xf32>
    %327 = arith.mulf %326, %325 : vector<1x256xf32>
    %c66 = arith.constant 66 : index
    %328 = memref.load %arg1[%c66] : memref<98xf32, #tpu.memory_space<smem>>
    %329 = vector.extract_strided_slice %322 {offsets = [1, 0, 0], sizes = [1, 1, 256], strides = [1, 1, 1]} : vector<2x1x256xf32> to vector<1x1x256xf32>
    %330 = vector.shape_cast %329 : vector<1x1x256xf32> to vector<1x256xf32>
    %331 = vector.broadcast %328 : f32 to vector<1x256xf32>
    %332 = arith.mulf %331, %330 : vector<1x256xf32>
    %333 = arith.addf %327, %332 : vector<1x256xf32>
    %334 = arith.addf %321, %333 : vector<1x256xf32>
    %c0_72 = arith.constant 0 : index
    %c0_73 = arith.constant 0 : index
    %c128_74 = arith.constant 128 : index
    %335 = vector.load %arg6[%c0_72, %c0_73, %c128_74] : memref<2x1x512xf32, #tpu.memory_space<vmem>>, vector<2x1x256xf32>
    %c24 = arith.constant 24 : index
    %336 = memref.load %arg1[%c24] : memref<98xf32, #tpu.memory_space<smem>>
    %337 = vector.extract_strided_slice %335 {offsets = [0, 0, 0], sizes = [1, 1, 256], strides = [1, 1, 1]} : vector<2x1x256xf32> to vector<1x1x256xf32>
    %338 = vector.shape_cast %337 : vector<1x1x256xf32> to vector<1x256xf32>
    %339 = vector.broadcast %336 : f32 to vector<1x256xf32>
    %340 = arith.mulf %339, %338 : vector<1x256xf32>
    %c73 = arith.constant 73 : index
    %341 = memref.load %arg1[%c73] : memref<98xf32, #tpu.memory_space<smem>>
    %342 = vector.extract_strided_slice %335 {offsets = [1, 0, 0], sizes = [1, 1, 256], strides = [1, 1, 1]} : vector<2x1x256xf32> to vector<1x1x256xf32>
    %343 = vector.shape_cast %342 : vector<1x1x256xf32> to vector<1x256xf32>
    %344 = vector.broadcast %341 : f32 to vector<1x256xf32>
    %345 = arith.mulf %344, %343 : vector<1x256xf32>
    %346 = arith.addf %340, %345 : vector<1x256xf32>
    %347 = arith.addf %334, %346 : vector<1x256xf32>
    %c0_75 = arith.constant 0 : index
    %c0_76 = arith.constant 0 : index
    %c144 = arith.constant 144 : index
    %348 = vector.load %arg6[%c0_75, %c0_76, %c144] : memref<2x1x512xf32, #tpu.memory_space<vmem>>, vector<2x1x256xf32>
    %c31 = arith.constant 31 : index
    %349 = memref.load %arg1[%c31] : memref<98xf32, #tpu.memory_space<smem>>
    %350 = vector.extract_strided_slice %348 {offsets = [0, 0, 0], sizes = [1, 1, 256], strides = [1, 1, 1]} : vector<2x1x256xf32> to vector<1x1x256xf32>
    %351 = vector.shape_cast %350 : vector<1x1x256xf32> to vector<1x256xf32>
    %352 = vector.broadcast %349 : f32 to vector<1x256xf32>
    %353 = arith.mulf %352, %351 : vector<1x256xf32>
    %c80_77 = arith.constant 80 : index
    %354 = memref.load %arg1[%c80_77] : memref<98xf32, #tpu.memory_space<smem>>
    %355 = vector.extract_strided_slice %348 {offsets = [1, 0, 0], sizes = [1, 1, 256], strides = [1, 1, 1]} : vector<2x1x256xf32> to vector<1x1x256xf32>
    %356 = vector.shape_cast %355 : vector<1x1x256xf32> to vector<1x256xf32>
    %357 = vector.broadcast %354 : f32 to vector<1x256xf32>
    %358 = arith.mulf %357, %356 : vector<1x256xf32>
    %359 = arith.addf %353, %358 : vector<1x256xf32>
    %360 = arith.addf %347, %359 : vector<1x256xf32>
    %c0_78 = arith.constant 0 : index
    %c0_79 = arith.constant 0 : index
    %c160 = arith.constant 160 : index
    %361 = vector.load %arg6[%c0_78, %c0_79, %c160] : memref<2x1x512xf32, #tpu.memory_space<vmem>>, vector<2x1x256xf32>
    %c38 = arith.constant 38 : index
    %362 = memref.load %arg1[%c38] : memref<98xf32, #tpu.memory_space<smem>>
    %363 = vector.extract_strided_slice %361 {offsets = [0, 0, 0], sizes = [1, 1, 256], strides = [1, 1, 1]} : vector<2x1x256xf32> to vector<1x1x256xf32>
    %364 = vector.shape_cast %363 : vector<1x1x256xf32> to vector<1x256xf32>
    %365 = vector.broadcast %362 : f32 to vector<1x256xf32>
    %366 = arith.mulf %365, %364 : vector<1x256xf32>
    %c87 = arith.constant 87 : index
    %367 = memref.load %arg1[%c87] : memref<98xf32, #tpu.memory_space<smem>>
    %368 = vector.extract_strided_slice %361 {offsets = [1, 0, 0], sizes = [1, 1, 256], strides = [1, 1, 1]} : vector<2x1x256xf32> to vector<1x1x256xf32>
    %369 = vector.shape_cast %368 : vector<1x1x256xf32> to vector<1x256xf32>
    %370 = vector.broadcast %367 : f32 to vector<1x256xf32>
    %371 = arith.mulf %370, %369 : vector<1x256xf32>
    %372 = arith.addf %366, %371 : vector<1x256xf32>
    %373 = arith.addf %360, %372 : vector<1x256xf32>
    %c0_80 = arith.constant 0 : index
    %c0_81 = arith.constant 0 : index
    %c176 = arith.constant 176 : index
    %374 = vector.load %arg6[%c0_80, %c0_81, %c176] : memref<2x1x512xf32, #tpu.memory_space<vmem>>, vector<2x1x256xf32>
    %c45 = arith.constant 45 : index
    %375 = memref.load %arg1[%c45] : memref<98xf32, #tpu.memory_space<smem>>
    %376 = vector.extract_strided_slice %374 {offsets = [0, 0, 0], sizes = [1, 1, 256], strides = [1, 1, 1]} : vector<2x1x256xf32> to vector<1x1x256xf32>
    %377 = vector.shape_cast %376 : vector<1x1x256xf32> to vector<1x256xf32>
    %378 = vector.broadcast %375 : f32 to vector<1x256xf32>
    %379 = arith.mulf %378, %377 : vector<1x256xf32>
    %c94_82 = arith.constant 94 : index
    %380 = memref.load %arg1[%c94_82] : memref<98xf32, #tpu.memory_space<smem>>
    %381 = vector.extract_strided_slice %374 {offsets = [1, 0, 0], sizes = [1, 1, 256], strides = [1, 1, 1]} : vector<2x1x256xf32> to vector<1x1x256xf32>
    %382 = vector.shape_cast %381 : vector<1x1x256xf32> to vector<1x256xf32>
    %383 = vector.broadcast %380 : f32 to vector<1x256xf32>
    %384 = arith.mulf %383, %382 : vector<1x256xf32>
    %385 = arith.addf %379, %384 : vector<1x256xf32>
    %386 = arith.addf %373, %385 : vector<1x256xf32>
    %387 = vector.extract_strided_slice %15 {offsets = [3, 0], sizes = [1, 256], strides = [1, 1]} : vector<7x256xf32> to vector<1x256xf32>
    %388 = arith.mulf %386, %387 : vector<1x256xf32>
    %389 = arith.addf %296, %388 : vector<1x256xf32>
    %c0_83 = arith.constant 0 : index
    %c0_84 = arith.constant 0 : index
    %c81 = arith.constant 81 : index
    %390 = vector.load %arg6[%c0_83, %c0_84, %c81] : memref<2x1x512xf32, #tpu.memory_space<vmem>>, vector<2x1x256xf32>
    %c4 = arith.constant 4 : index
    %391 = memref.load %arg1[%c4] : memref<98xf32, #tpu.memory_space<smem>>
    %392 = vector.extract_strided_slice %390 {offsets = [0, 0, 0], sizes = [1, 1, 256], strides = [1, 1, 1]} : vector<2x1x256xf32> to vector<1x1x256xf32>
    %393 = vector.shape_cast %392 : vector<1x1x256xf32> to vector<1x256xf32>
    %394 = vector.broadcast %391 : f32 to vector<1x256xf32>
    %395 = arith.mulf %394, %393 : vector<1x256xf32>
    %c53 = arith.constant 53 : index
    %396 = memref.load %arg1[%c53] : memref<98xf32, #tpu.memory_space<smem>>
    %397 = vector.extract_strided_slice %390 {offsets = [1, 0, 0], sizes = [1, 1, 256], strides = [1, 1, 1]} : vector<2x1x256xf32> to vector<1x1x256xf32>
    %398 = vector.shape_cast %397 : vector<1x1x256xf32> to vector<1x256xf32>
    %399 = vector.broadcast %396 : f32 to vector<1x256xf32>
    %400 = arith.mulf %399, %398 : vector<1x256xf32>
    %401 = arith.addf %395, %400 : vector<1x256xf32>
    %c0_85 = arith.constant 0 : index
    %c0_86 = arith.constant 0 : index
    %c97 = arith.constant 97 : index
    %402 = vector.load %arg6[%c0_85, %c0_86, %c97] : memref<2x1x512xf32, #tpu.memory_space<vmem>>, vector<2x1x256xf32>
    %c11 = arith.constant 11 : index
    %403 = memref.load %arg1[%c11] : memref<98xf32, #tpu.memory_space<smem>>
    %404 = vector.extract_strided_slice %402 {offsets = [0, 0, 0], sizes = [1, 1, 256], strides = [1, 1, 1]} : vector<2x1x256xf32> to vector<1x1x256xf32>
    %405 = vector.shape_cast %404 : vector<1x1x256xf32> to vector<1x256xf32>
    %406 = vector.broadcast %403 : f32 to vector<1x256xf32>
    %407 = arith.mulf %406, %405 : vector<1x256xf32>
    %c60 = arith.constant 60 : index
    %408 = memref.load %arg1[%c60] : memref<98xf32, #tpu.memory_space<smem>>
    %409 = vector.extract_strided_slice %402 {offsets = [1, 0, 0], sizes = [1, 1, 256], strides = [1, 1, 1]} : vector<2x1x256xf32> to vector<1x1x256xf32>
    %410 = vector.shape_cast %409 : vector<1x1x256xf32> to vector<1x256xf32>
    %411 = vector.broadcast %408 : f32 to vector<1x256xf32>
    %412 = arith.mulf %411, %410 : vector<1x256xf32>
    %413 = arith.addf %407, %412 : vector<1x256xf32>
    %414 = arith.addf %401, %413 : vector<1x256xf32>
    %c0_87 = arith.constant 0 : index
    %c0_88 = arith.constant 0 : index
    %c113 = arith.constant 113 : index
    %415 = vector.load %arg6[%c0_87, %c0_88, %c113] : memref<2x1x512xf32, #tpu.memory_space<vmem>>, vector<2x1x256xf32>
    %c18 = arith.constant 18 : index
    %416 = memref.load %arg1[%c18] : memref<98xf32, #tpu.memory_space<smem>>
    %417 = vector.extract_strided_slice %415 {offsets = [0, 0, 0], sizes = [1, 1, 256], strides = [1, 1, 1]} : vector<2x1x256xf32> to vector<1x1x256xf32>
    %418 = vector.shape_cast %417 : vector<1x1x256xf32> to vector<1x256xf32>
    %419 = vector.broadcast %416 : f32 to vector<1x256xf32>
    %420 = arith.mulf %419, %418 : vector<1x256xf32>
    %c67 = arith.constant 67 : index
    %421 = memref.load %arg1[%c67] : memref<98xf32, #tpu.memory_space<smem>>
    %422 = vector.extract_strided_slice %415 {offsets = [1, 0, 0], sizes = [1, 1, 256], strides = [1, 1, 1]} : vector<2x1x256xf32> to vector<1x1x256xf32>
    %423 = vector.shape_cast %422 : vector<1x1x256xf32> to vector<1x256xf32>
    %424 = vector.broadcast %421 : f32 to vector<1x256xf32>
    %425 = arith.mulf %424, %423 : vector<1x256xf32>
    %426 = arith.addf %420, %425 : vector<1x256xf32>
    %427 = arith.addf %414, %426 : vector<1x256xf32>
    %c0_89 = arith.constant 0 : index
    %c0_90 = arith.constant 0 : index
    %c129 = arith.constant 129 : index
    %428 = vector.load %arg6[%c0_89, %c0_90, %c129] : memref<2x1x512xf32, #tpu.memory_space<vmem>>, vector<2x1x256xf32>
    %c25 = arith.constant 25 : index
    %429 = memref.load %arg1[%c25] : memref<98xf32, #tpu.memory_space<smem>>
    %430 = vector.extract_strided_slice %428 {offsets = [0, 0, 0], sizes = [1, 1, 256], strides = [1, 1, 1]} : vector<2x1x256xf32> to vector<1x1x256xf32>
    %431 = vector.shape_cast %430 : vector<1x1x256xf32> to vector<1x256xf32>
    %432 = vector.broadcast %429 : f32 to vector<1x256xf32>
    %433 = arith.mulf %432, %431 : vector<1x256xf32>
    %c74 = arith.constant 74 : index
    %434 = memref.load %arg1[%c74] : memref<98xf32, #tpu.memory_space<smem>>
    %435 = vector.extract_strided_slice %428 {offsets = [1, 0, 0], sizes = [1, 1, 256], strides = [1, 1, 1]} : vector<2x1x256xf32> to vector<1x1x256xf32>
    %436 = vector.shape_cast %435 : vector<1x1x256xf32> to vector<1x256xf32>
    %437 = vector.broadcast %434 : f32 to vector<1x256xf32>
    %438 = arith.mulf %437, %436 : vector<1x256xf32>
    %439 = arith.addf %433, %438 : vector<1x256xf32>
    %440 = arith.addf %427, %439 : vector<1x256xf32>
    %c0_91 = arith.constant 0 : index
    %c0_92 = arith.constant 0 : index
    %c145 = arith.constant 145 : index
    %441 = vector.load %arg6[%c0_91, %c0_92, %c145] : memref<2x1x512xf32, #tpu.memory_space<vmem>>, vector<2x1x256xf32>
    %c32 = arith.constant 32 : index
    %442 = memref.load %arg1[%c32] : memref<98xf32, #tpu.memory_space<smem>>
    %443 = vector.extract_strided_slice %441 {offsets = [0, 0, 0], sizes = [1, 1, 256], strides = [1, 1, 1]} : vector<2x1x256xf32> to vector<1x1x256xf32>
    %444 = vector.shape_cast %443 : vector<1x1x256xf32> to vector<1x256xf32>
    %445 = vector.broadcast %442 : f32 to vector<1x256xf32>
    %446 = arith.mulf %445, %444 : vector<1x256xf32>
    %c81_93 = arith.constant 81 : index
    %447 = memref.load %arg1[%c81_93] : memref<98xf32, #tpu.memory_space<smem>>
    %448 = vector.extract_strided_slice %441 {offsets = [1, 0, 0], sizes = [1, 1, 256], strides = [1, 1, 1]} : vector<2x1x256xf32> to vector<1x1x256xf32>
    %449 = vector.shape_cast %448 : vector<1x1x256xf32> to vector<1x256xf32>
    %450 = vector.broadcast %447 : f32 to vector<1x256xf32>
    %451 = arith.mulf %450, %449 : vector<1x256xf32>
    %452 = arith.addf %446, %451 : vector<1x256xf32>
    %453 = arith.addf %440, %452 : vector<1x256xf32>
    %c0_94 = arith.constant 0 : index
    %c0_95 = arith.constant 0 : index
    %c161 = arith.constant 161 : index
    %454 = vector.load %arg6[%c0_94, %c0_95, %c161] : memref<2x1x512xf32, #tpu.memory_space<vmem>>, vector<2x1x256xf32>
    %c39 = arith.constant 39 : index
    %455 = memref.load %arg1[%c39] : memref<98xf32, #tpu.memory_space<smem>>
    %456 = vector.extract_strided_slice %454 {offsets = [0, 0, 0], sizes = [1, 1, 256], strides = [1, 1, 1]} : vector<2x1x256xf32> to vector<1x1x256xf32>
    %457 = vector.shape_cast %456 : vector<1x1x256xf32> to vector<1x256xf32>
    %458 = vector.broadcast %455 : f32 to vector<1x256xf32>
    %459 = arith.mulf %458, %457 : vector<1x256xf32>
    %c88 = arith.constant 88 : index
    %460 = memref.load %arg1[%c88] : memref<98xf32, #tpu.memory_space<smem>>
    %461 = vector.extract_strided_slice %454 {offsets = [1, 0, 0], sizes = [1, 1, 256], strides = [1, 1, 1]} : vector<2x1x256xf32> to vector<1x1x256xf32>
    %462 = vector.shape_cast %461 : vector<1x1x256xf32> to vector<1x256xf32>
    %463 = vector.broadcast %460 : f32 to vector<1x256xf32>
    %464 = arith.mulf %463, %462 : vector<1x256xf32>
    %465 = arith.addf %459, %464 : vector<1x256xf32>
    %466 = arith.addf %453, %465 : vector<1x256xf32>
    %c0_96 = arith.constant 0 : index
    %c0_97 = arith.constant 0 : index
    %c177 = arith.constant 177 : index
    %467 = vector.load %arg6[%c0_96, %c0_97, %c177] : memref<2x1x512xf32, #tpu.memory_space<vmem>>, vector<2x1x256xf32>
    %c46 = arith.constant 46 : index
    %468 = memref.load %arg1[%c46] : memref<98xf32, #tpu.memory_space<smem>>
    %469 = vector.extract_strided_slice %467 {offsets = [0, 0, 0], sizes = [1, 1, 256], strides = [1, 1, 1]} : vector<2x1x256xf32> to vector<1x1x256xf32>
    %470 = vector.shape_cast %469 : vector<1x1x256xf32> to vector<1x256xf32>
    %471 = vector.broadcast %468 : f32 to vector<1x256xf32>
    %472 = arith.mulf %471, %470 : vector<1x256xf32>
    %c95_98 = arith.constant 95 : index
    %473 = memref.load %arg1[%c95_98] : memref<98xf32, #tpu.memory_space<smem>>
    %474 = vector.extract_strided_slice %467 {offsets = [1, 0, 0], sizes = [1, 1, 256], strides = [1, 1, 1]} : vector<2x1x256xf32> to vector<1x1x256xf32>
    %475 = vector.shape_cast %474 : vector<1x1x256xf32> to vector<1x256xf32>
    %476 = vector.broadcast %473 : f32 to vector<1x256xf32>
    %477 = arith.mulf %476, %475 : vector<1x256xf32>
    %478 = arith.addf %472, %477 : vector<1x256xf32>
    %479 = arith.addf %466, %478 : vector<1x256xf32>
    %480 = vector.extract_strided_slice %15 {offsets = [4, 0], sizes = [1, 256], strides = [1, 1]} : vector<7x256xf32> to vector<1x256xf32>
    %481 = arith.mulf %479, %480 : vector<1x256xf32>
    %482 = arith.addf %389, %481 : vector<1x256xf32>
    %c0_99 = arith.constant 0 : index
    %c0_100 = arith.constant 0 : index
    %c82 = arith.constant 82 : index
    %483 = vector.load %arg6[%c0_99, %c0_100, %c82] : memref<2x1x512xf32, #tpu.memory_space<vmem>>, vector<2x1x256xf32>
    %c5 = arith.constant 5 : index
    %484 = memref.load %arg1[%c5] : memref<98xf32, #tpu.memory_space<smem>>
    %485 = vector.extract_strided_slice %483 {offsets = [0, 0, 0], sizes = [1, 1, 256], strides = [1, 1, 1]} : vector<2x1x256xf32> to vector<1x1x256xf32>
    %486 = vector.shape_cast %485 : vector<1x1x256xf32> to vector<1x256xf32>
    %487 = vector.broadcast %484 : f32 to vector<1x256xf32>
    %488 = arith.mulf %487, %486 : vector<1x256xf32>
    %c54 = arith.constant 54 : index
    %489 = memref.load %arg1[%c54] : memref<98xf32, #tpu.memory_space<smem>>
    %490 = vector.extract_strided_slice %483 {offsets = [1, 0, 0], sizes = [1, 1, 256], strides = [1, 1, 1]} : vector<2x1x256xf32> to vector<1x1x256xf32>
    %491 = vector.shape_cast %490 : vector<1x1x256xf32> to vector<1x256xf32>
    %492 = vector.broadcast %489 : f32 to vector<1x256xf32>
    %493 = arith.mulf %492, %491 : vector<1x256xf32>
    %494 = arith.addf %488, %493 : vector<1x256xf32>
    %c0_101 = arith.constant 0 : index
    %c0_102 = arith.constant 0 : index
    %c98 = arith.constant 98 : index
    %495 = vector.load %arg6[%c0_101, %c0_102, %c98] : memref<2x1x512xf32, #tpu.memory_space<vmem>>, vector<2x1x256xf32>
    %c12 = arith.constant 12 : index
    %496 = memref.load %arg1[%c12] : memref<98xf32, #tpu.memory_space<smem>>
    %497 = vector.extract_strided_slice %495 {offsets = [0, 0, 0], sizes = [1, 1, 256], strides = [1, 1, 1]} : vector<2x1x256xf32> to vector<1x1x256xf32>
    %498 = vector.shape_cast %497 : vector<1x1x256xf32> to vector<1x256xf32>
    %499 = vector.broadcast %496 : f32 to vector<1x256xf32>
    %500 = arith.mulf %499, %498 : vector<1x256xf32>
    %c61 = arith.constant 61 : index
    %501 = memref.load %arg1[%c61] : memref<98xf32, #tpu.memory_space<smem>>
    %502 = vector.extract_strided_slice %495 {offsets = [1, 0, 0], sizes = [1, 1, 256], strides = [1, 1, 1]} : vector<2x1x256xf32> to vector<1x1x256xf32>
    %503 = vector.shape_cast %502 : vector<1x1x256xf32> to vector<1x256xf32>
    %504 = vector.broadcast %501 : f32 to vector<1x256xf32>
    %505 = arith.mulf %504, %503 : vector<1x256xf32>
    %506 = arith.addf %500, %505 : vector<1x256xf32>
    %507 = arith.addf %494, %506 : vector<1x256xf32>
    %c0_103 = arith.constant 0 : index
    %c0_104 = arith.constant 0 : index
    %c114 = arith.constant 114 : index
    %508 = vector.load %arg6[%c0_103, %c0_104, %c114] : memref<2x1x512xf32, #tpu.memory_space<vmem>>, vector<2x1x256xf32>
    %c19 = arith.constant 19 : index
    %509 = memref.load %arg1[%c19] : memref<98xf32, #tpu.memory_space<smem>>
    %510 = vector.extract_strided_slice %508 {offsets = [0, 0, 0], sizes = [1, 1, 256], strides = [1, 1, 1]} : vector<2x1x256xf32> to vector<1x1x256xf32>
    %511 = vector.shape_cast %510 : vector<1x1x256xf32> to vector<1x256xf32>
    %512 = vector.broadcast %509 : f32 to vector<1x256xf32>
    %513 = arith.mulf %512, %511 : vector<1x256xf32>
    %c68 = arith.constant 68 : index
    %514 = memref.load %arg1[%c68] : memref<98xf32, #tpu.memory_space<smem>>
    %515 = vector.extract_strided_slice %508 {offsets = [1, 0, 0], sizes = [1, 1, 256], strides = [1, 1, 1]} : vector<2x1x256xf32> to vector<1x1x256xf32>
    %516 = vector.shape_cast %515 : vector<1x1x256xf32> to vector<1x256xf32>
    %517 = vector.broadcast %514 : f32 to vector<1x256xf32>
    %518 = arith.mulf %517, %516 : vector<1x256xf32>
    %519 = arith.addf %513, %518 : vector<1x256xf32>
    %520 = arith.addf %507, %519 : vector<1x256xf32>
    %c0_105 = arith.constant 0 : index
    %c0_106 = arith.constant 0 : index
    %c130 = arith.constant 130 : index
    %521 = vector.load %arg6[%c0_105, %c0_106, %c130] : memref<2x1x512xf32, #tpu.memory_space<vmem>>, vector<2x1x256xf32>
    %c26 = arith.constant 26 : index
    %522 = memref.load %arg1[%c26] : memref<98xf32, #tpu.memory_space<smem>>
    %523 = vector.extract_strided_slice %521 {offsets = [0, 0, 0], sizes = [1, 1, 256], strides = [1, 1, 1]} : vector<2x1x256xf32> to vector<1x1x256xf32>
    %524 = vector.shape_cast %523 : vector<1x1x256xf32> to vector<1x256xf32>
    %525 = vector.broadcast %522 : f32 to vector<1x256xf32>
    %526 = arith.mulf %525, %524 : vector<1x256xf32>
    %c75 = arith.constant 75 : index
    %527 = memref.load %arg1[%c75] : memref<98xf32, #tpu.memory_space<smem>>
    %528 = vector.extract_strided_slice %521 {offsets = [1, 0, 0], sizes = [1, 1, 256], strides = [1, 1, 1]} : vector<2x1x256xf32> to vector<1x1x256xf32>
    %529 = vector.shape_cast %528 : vector<1x1x256xf32> to vector<1x256xf32>
    %530 = vector.broadcast %527 : f32 to vector<1x256xf32>
    %531 = arith.mulf %530, %529 : vector<1x256xf32>
    %532 = arith.addf %526, %531 : vector<1x256xf32>
    %533 = arith.addf %520, %532 : vector<1x256xf32>
    %c0_107 = arith.constant 0 : index
    %c0_108 = arith.constant 0 : index
    %c146 = arith.constant 146 : index
    %534 = vector.load %arg6[%c0_107, %c0_108, %c146] : memref<2x1x512xf32, #tpu.memory_space<vmem>>, vector<2x1x256xf32>
    %c33 = arith.constant 33 : index
    %535 = memref.load %arg1[%c33] : memref<98xf32, #tpu.memory_space<smem>>
    %536 = vector.extract_strided_slice %534 {offsets = [0, 0, 0], sizes = [1, 1, 256], strides = [1, 1, 1]} : vector<2x1x256xf32> to vector<1x1x256xf32>
    %537 = vector.shape_cast %536 : vector<1x1x256xf32> to vector<1x256xf32>
    %538 = vector.broadcast %535 : f32 to vector<1x256xf32>
    %539 = arith.mulf %538, %537 : vector<1x256xf32>
    %c82_109 = arith.constant 82 : index
    %540 = memref.load %arg1[%c82_109] : memref<98xf32, #tpu.memory_space<smem>>
    %541 = vector.extract_strided_slice %534 {offsets = [1, 0, 0], sizes = [1, 1, 256], strides = [1, 1, 1]} : vector<2x1x256xf32> to vector<1x1x256xf32>
    %542 = vector.shape_cast %541 : vector<1x1x256xf32> to vector<1x256xf32>
    %543 = vector.broadcast %540 : f32 to vector<1x256xf32>
    %544 = arith.mulf %543, %542 : vector<1x256xf32>
    %545 = arith.addf %539, %544 : vector<1x256xf32>
    %546 = arith.addf %533, %545 : vector<1x256xf32>
    %c0_110 = arith.constant 0 : index
    %c0_111 = arith.constant 0 : index
    %c162 = arith.constant 162 : index
    %547 = vector.load %arg6[%c0_110, %c0_111, %c162] : memref<2x1x512xf32, #tpu.memory_space<vmem>>, vector<2x1x256xf32>
    %c40 = arith.constant 40 : index
    %548 = memref.load %arg1[%c40] : memref<98xf32, #tpu.memory_space<smem>>
    %549 = vector.extract_strided_slice %547 {offsets = [0, 0, 0], sizes = [1, 1, 256], strides = [1, 1, 1]} : vector<2x1x256xf32> to vector<1x1x256xf32>
    %550 = vector.shape_cast %549 : vector<1x1x256xf32> to vector<1x256xf32>
    %551 = vector.broadcast %548 : f32 to vector<1x256xf32>
    %552 = arith.mulf %551, %550 : vector<1x256xf32>
    %c89 = arith.constant 89 : index
    %553 = memref.load %arg1[%c89] : memref<98xf32, #tpu.memory_space<smem>>
    %554 = vector.extract_strided_slice %547 {offsets = [1, 0, 0], sizes = [1, 1, 256], strides = [1, 1, 1]} : vector<2x1x256xf32> to vector<1x1x256xf32>
    %555 = vector.shape_cast %554 : vector<1x1x256xf32> to vector<1x256xf32>
    %556 = vector.broadcast %553 : f32 to vector<1x256xf32>
    %557 = arith.mulf %556, %555 : vector<1x256xf32>
    %558 = arith.addf %552, %557 : vector<1x256xf32>
    %559 = arith.addf %546, %558 : vector<1x256xf32>
    %c0_112 = arith.constant 0 : index
    %c0_113 = arith.constant 0 : index
    %c178 = arith.constant 178 : index
    %560 = vector.load %arg6[%c0_112, %c0_113, %c178] : memref<2x1x512xf32, #tpu.memory_space<vmem>>, vector<2x1x256xf32>
    %c47 = arith.constant 47 : index
    %561 = memref.load %arg1[%c47] : memref<98xf32, #tpu.memory_space<smem>>
    %562 = vector.extract_strided_slice %560 {offsets = [0, 0, 0], sizes = [1, 1, 256], strides = [1, 1, 1]} : vector<2x1x256xf32> to vector<1x1x256xf32>
    %563 = vector.shape_cast %562 : vector<1x1x256xf32> to vector<1x256xf32>
    %564 = vector.broadcast %561 : f32 to vector<1x256xf32>
    %565 = arith.mulf %564, %563 : vector<1x256xf32>
    %c96_114 = arith.constant 96 : index
    %566 = memref.load %arg1[%c96_114] : memref<98xf32, #tpu.memory_space<smem>>
    %567 = vector.extract_strided_slice %560 {offsets = [1, 0, 0], sizes = [1, 1, 256], strides = [1, 1, 1]} : vector<2x1x256xf32> to vector<1x1x256xf32>
    %568 = vector.shape_cast %567 : vector<1x1x256xf32> to vector<1x256xf32>
    %569 = vector.broadcast %566 : f32 to vector<1x256xf32>
    %570 = arith.mulf %569, %568 : vector<1x256xf32>
    %571 = arith.addf %565, %570 : vector<1x256xf32>
    %572 = arith.addf %559, %571 : vector<1x256xf32>
    %573 = vector.extract_strided_slice %15 {offsets = [5, 0], sizes = [1, 256], strides = [1, 1]} : vector<7x256xf32> to vector<1x256xf32>
    %574 = arith.mulf %572, %573 : vector<1x256xf32>
    %575 = arith.addf %482, %574 : vector<1x256xf32>
    %c0_115 = arith.constant 0 : index
    %c0_116 = arith.constant 0 : index
    %c83 = arith.constant 83 : index
    %576 = vector.load %arg6[%c0_115, %c0_116, %c83] : memref<2x1x512xf32, #tpu.memory_space<vmem>>, vector<2x1x256xf32>
    %c6 = arith.constant 6 : index
    %577 = memref.load %arg1[%c6] : memref<98xf32, #tpu.memory_space<smem>>
    %578 = vector.extract_strided_slice %576 {offsets = [0, 0, 0], sizes = [1, 1, 256], strides = [1, 1, 1]} : vector<2x1x256xf32> to vector<1x1x256xf32>
    %579 = vector.shape_cast %578 : vector<1x1x256xf32> to vector<1x256xf32>
    %580 = vector.broadcast %577 : f32 to vector<1x256xf32>
    %581 = arith.mulf %580, %579 : vector<1x256xf32>
    %c55 = arith.constant 55 : index
    %582 = memref.load %arg1[%c55] : memref<98xf32, #tpu.memory_space<smem>>
    %583 = vector.extract_strided_slice %576 {offsets = [1, 0, 0], sizes = [1, 1, 256], strides = [1, 1, 1]} : vector<2x1x256xf32> to vector<1x1x256xf32>
    %584 = vector.shape_cast %583 : vector<1x1x256xf32> to vector<1x256xf32>
    %585 = vector.broadcast %582 : f32 to vector<1x256xf32>
    %586 = arith.mulf %585, %584 : vector<1x256xf32>
    %587 = arith.addf %581, %586 : vector<1x256xf32>
    %c0_117 = arith.constant 0 : index
    %c0_118 = arith.constant 0 : index
    %c99 = arith.constant 99 : index
    %588 = vector.load %arg6[%c0_117, %c0_118, %c99] : memref<2x1x512xf32, #tpu.memory_space<vmem>>, vector<2x1x256xf32>
    %c13 = arith.constant 13 : index
    %589 = memref.load %arg1[%c13] : memref<98xf32, #tpu.memory_space<smem>>
    %590 = vector.extract_strided_slice %588 {offsets = [0, 0, 0], sizes = [1, 1, 256], strides = [1, 1, 1]} : vector<2x1x256xf32> to vector<1x1x256xf32>
    %591 = vector.shape_cast %590 : vector<1x1x256xf32> to vector<1x256xf32>
    %592 = vector.broadcast %589 : f32 to vector<1x256xf32>
    %593 = arith.mulf %592, %591 : vector<1x256xf32>
    %c62 = arith.constant 62 : index
    %594 = memref.load %arg1[%c62] : memref<98xf32, #tpu.memory_space<smem>>
    %595 = vector.extract_strided_slice %588 {offsets = [1, 0, 0], sizes = [1, 1, 256], strides = [1, 1, 1]} : vector<2x1x256xf32> to vector<1x1x256xf32>
    %596 = vector.shape_cast %595 : vector<1x1x256xf32> to vector<1x256xf32>
    %597 = vector.broadcast %594 : f32 to vector<1x256xf32>
    %598 = arith.mulf %597, %596 : vector<1x256xf32>
    %599 = arith.addf %593, %598 : vector<1x256xf32>
    %600 = arith.addf %587, %599 : vector<1x256xf32>
    %c0_119 = arith.constant 0 : index
    %c0_120 = arith.constant 0 : index
    %c115 = arith.constant 115 : index
    %601 = vector.load %arg6[%c0_119, %c0_120, %c115] : memref<2x1x512xf32, #tpu.memory_space<vmem>>, vector<2x1x256xf32>
    %c20 = arith.constant 20 : index
    %602 = memref.load %arg1[%c20] : memref<98xf32, #tpu.memory_space<smem>>
    %603 = vector.extract_strided_slice %601 {offsets = [0, 0, 0], sizes = [1, 1, 256], strides = [1, 1, 1]} : vector<2x1x256xf32> to vector<1x1x256xf32>
    %604 = vector.shape_cast %603 : vector<1x1x256xf32> to vector<1x256xf32>
    %605 = vector.broadcast %602 : f32 to vector<1x256xf32>
    %606 = arith.mulf %605, %604 : vector<1x256xf32>
    %c69 = arith.constant 69 : index
    %607 = memref.load %arg1[%c69] : memref<98xf32, #tpu.memory_space<smem>>
    %608 = vector.extract_strided_slice %601 {offsets = [1, 0, 0], sizes = [1, 1, 256], strides = [1, 1, 1]} : vector<2x1x256xf32> to vector<1x1x256xf32>
    %609 = vector.shape_cast %608 : vector<1x1x256xf32> to vector<1x256xf32>
    %610 = vector.broadcast %607 : f32 to vector<1x256xf32>
    %611 = arith.mulf %610, %609 : vector<1x256xf32>
    %612 = arith.addf %606, %611 : vector<1x256xf32>
    %613 = arith.addf %600, %612 : vector<1x256xf32>
    %c0_121 = arith.constant 0 : index
    %c0_122 = arith.constant 0 : index
    %c131 = arith.constant 131 : index
    %614 = vector.load %arg6[%c0_121, %c0_122, %c131] : memref<2x1x512xf32, #tpu.memory_space<vmem>>, vector<2x1x256xf32>
    %c27 = arith.constant 27 : index
    %615 = memref.load %arg1[%c27] : memref<98xf32, #tpu.memory_space<smem>>
    %616 = vector.extract_strided_slice %614 {offsets = [0, 0, 0], sizes = [1, 1, 256], strides = [1, 1, 1]} : vector<2x1x256xf32> to vector<1x1x256xf32>
    %617 = vector.shape_cast %616 : vector<1x1x256xf32> to vector<1x256xf32>
    %618 = vector.broadcast %615 : f32 to vector<1x256xf32>
    %619 = arith.mulf %618, %617 : vector<1x256xf32>
    %c76 = arith.constant 76 : index
    %620 = memref.load %arg1[%c76] : memref<98xf32, #tpu.memory_space<smem>>
    %621 = vector.extract_strided_slice %614 {offsets = [1, 0, 0], sizes = [1, 1, 256], strides = [1, 1, 1]} : vector<2x1x256xf32> to vector<1x1x256xf32>
    %622 = vector.shape_cast %621 : vector<1x1x256xf32> to vector<1x256xf32>
    %623 = vector.broadcast %620 : f32 to vector<1x256xf32>
    %624 = arith.mulf %623, %622 : vector<1x256xf32>
    %625 = arith.addf %619, %624 : vector<1x256xf32>
    %626 = arith.addf %613, %625 : vector<1x256xf32>
    %c0_123 = arith.constant 0 : index
    %c0_124 = arith.constant 0 : index
    %c147 = arith.constant 147 : index
    %627 = vector.load %arg6[%c0_123, %c0_124, %c147] : memref<2x1x512xf32, #tpu.memory_space<vmem>>, vector<2x1x256xf32>
    %c34 = arith.constant 34 : index
    %628 = memref.load %arg1[%c34] : memref<98xf32, #tpu.memory_space<smem>>
    %629 = vector.extract_strided_slice %627 {offsets = [0, 0, 0], sizes = [1, 1, 256], strides = [1, 1, 1]} : vector<2x1x256xf32> to vector<1x1x256xf32>
    %630 = vector.shape_cast %629 : vector<1x1x256xf32> to vector<1x256xf32>
    %631 = vector.broadcast %628 : f32 to vector<1x256xf32>
    %632 = arith.mulf %631, %630 : vector<1x256xf32>
    %c83_125 = arith.constant 83 : index
    %633 = memref.load %arg1[%c83_125] : memref<98xf32, #tpu.memory_space<smem>>
    %634 = vector.extract_strided_slice %627 {offsets = [1, 0, 0], sizes = [1, 1, 256], strides = [1, 1, 1]} : vector<2x1x256xf32> to vector<1x1x256xf32>
    %635 = vector.shape_cast %634 : vector<1x1x256xf32> to vector<1x256xf32>
    %636 = vector.broadcast %633 : f32 to vector<1x256xf32>
    %637 = arith.mulf %636, %635 : vector<1x256xf32>
    %638 = arith.addf %632, %637 : vector<1x256xf32>
    %639 = arith.addf %626, %638 : vector<1x256xf32>
    %c0_126 = arith.constant 0 : index
    %c0_127 = arith.constant 0 : index
    %c163 = arith.constant 163 : index
    %640 = vector.load %arg6[%c0_126, %c0_127, %c163] : memref<2x1x512xf32, #tpu.memory_space<vmem>>, vector<2x1x256xf32>
    %c41 = arith.constant 41 : index
    %641 = memref.load %arg1[%c41] : memref<98xf32, #tpu.memory_space<smem>>
    %642 = vector.extract_strided_slice %640 {offsets = [0, 0, 0], sizes = [1, 1, 256], strides = [1, 1, 1]} : vector<2x1x256xf32> to vector<1x1x256xf32>
    %643 = vector.shape_cast %642 : vector<1x1x256xf32> to vector<1x256xf32>
    %644 = vector.broadcast %641 : f32 to vector<1x256xf32>
    %645 = arith.mulf %644, %643 : vector<1x256xf32>
    %c90 = arith.constant 90 : index
    %646 = memref.load %arg1[%c90] : memref<98xf32, #tpu.memory_space<smem>>
    %647 = vector.extract_strided_slice %640 {offsets = [1, 0, 0], sizes = [1, 1, 256], strides = [1, 1, 1]} : vector<2x1x256xf32> to vector<1x1x256xf32>
    %648 = vector.shape_cast %647 : vector<1x1x256xf32> to vector<1x256xf32>
    %649 = vector.broadcast %646 : f32 to vector<1x256xf32>
    %650 = arith.mulf %649, %648 : vector<1x256xf32>
    %651 = arith.addf %645, %650 : vector<1x256xf32>
    %652 = arith.addf %639, %651 : vector<1x256xf32>
    %c0_128 = arith.constant 0 : index
    %c0_129 = arith.constant 0 : index
    %c179 = arith.constant 179 : index
    %653 = vector.load %arg6[%c0_128, %c0_129, %c179] : memref<2x1x512xf32, #tpu.memory_space<vmem>>, vector<2x1x256xf32>
    %c48 = arith.constant 48 : index
    %654 = memref.load %arg1[%c48] : memref<98xf32, #tpu.memory_space<smem>>
    %655 = vector.extract_strided_slice %653 {offsets = [0, 0, 0], sizes = [1, 1, 256], strides = [1, 1, 1]} : vector<2x1x256xf32> to vector<1x1x256xf32>
    %656 = vector.shape_cast %655 : vector<1x1x256xf32> to vector<1x256xf32>
    %657 = vector.broadcast %654 : f32 to vector<1x256xf32>
    %658 = arith.mulf %657, %656 : vector<1x256xf32>
    %c97_130 = arith.constant 97 : index
    %659 = memref.load %arg1[%c97_130] : memref<98xf32, #tpu.memory_space<smem>>
    %660 = vector.extract_strided_slice %653 {offsets = [1, 0, 0], sizes = [1, 1, 256], strides = [1, 1, 1]} : vector<2x1x256xf32> to vector<1x1x256xf32>
    %661 = vector.shape_cast %660 : vector<1x1x256xf32> to vector<1x256xf32>
    %662 = vector.broadcast %659 : f32 to vector<1x256xf32>
    %663 = arith.mulf %662, %661 : vector<1x256xf32>
    %664 = arith.addf %658, %663 : vector<1x256xf32>
    %665 = arith.addf %652, %664 : vector<1x256xf32>
    %666 = vector.extract_strided_slice %15 {offsets = [6, 0], sizes = [1, 256], strides = [1, 1]} : vector<7x256xf32> to vector<1x256xf32>
    %667 = arith.mulf %665, %666 : vector<1x256xf32>
    %668 = arith.addf %575, %667 : vector<1x256xf32>
    %669 = arith.negf %668 : vector<1x256xf32>
    %670 = math.exp %669 : vector<1x256xf32>
    %cst_131 = arith.constant 1.000000e+00 : f32
    %671 = vector.broadcast %cst_131 : f32 to vector<1x256xf32>
    %672 = arith.addf %671, %670 : vector<1x256xf32>
    %673 = arith.divf %671, %672 : vector<1x256xf32>
    %674 = vector.shape_cast %673 : vector<1x256xf32> to vector<1x1x256xf32>
    %675 = vector.broadcast %674 : vector<1x1x256xf32> to vector<1x4x256xf32>
    %676 = arith.mulf %4, %675 : vector<1x4x256xf32>
    %c0_132 = arith.constant 0 : index
    %c0_133 = arith.constant 0 : index
    %c0_134 = arith.constant 0 : index
    %677 = vector.load %arg5[%c0_132, %c0_133, %c0_134] : memref<1x4x256xf32, #tpu.memory_space<vmem>>, vector<1x4x256xf32>
    tpu.vector_store %arg5[%c0_132, %c0_133, %c0_134], %676 {strides = array<i32>} : memref<1x4x256xf32, #tpu.memory_space<vmem>>, vector<1x4x256xf32>,
    return
  }
  func.func @transform_0(%arg0: i32) -> i32 {
    %c0_i32 = arith.constant 0 : i32
    %c0_i32_0 = arith.constant 0 : i32
    return %c0_i32 : i32
  }
  func.func @transform_1(%arg0: i32) -> i32 {
    %c0_i32 = arith.constant 0 : i32
    %c0_i32_0 = arith.constant 0 : i32
    return %c0_i32 : i32
  }
  func.func @transform_2(%arg0: i32) -> (i32, i32) {
    %c0_i32 = arith.constant 0 : i32
    %c0_i32_0 = arith.constant 0 : i32
    %c0_i32_1 = arith.constant 0 : i32
    return %c0_i32, %c0_i32_0 : i32, i32
  }
  func.func @transform_3(%arg0: i32) -> (i32, i32, i32) {
    %c0_i32 = arith.constant 0 : i32
    %c0_i32_0 = arith.constant 0 : i32
    %c0_i32_1 = arith.constant 0 : i32
    return %arg0, %c0_i32, %c0_i32_0 : i32, i32, i32
  }
  func.func @transform_4(%arg0: i32) -> (i32, i32, i32) {
    %c0_i32 = arith.constant 0 : i32
    %c0_i32_0 = arith.constant 0 : i32
    %c0_i32_1 = arith.constant 0 : i32
    return %arg0, %c0_i32, %c0_i32_0 : i32, i32, i32
  }
}

</mosaic_0001>

<bundles_post_ra>
// kernel: tpu_custom_call.1
= control target key start
LH: loop header
LB: loop body
LE: loop exit
PB: predicated region body
PF: predicated region fallthrough
CT: control target
= control target key end

     0   :  { %s2539_s0 = inlined_call_operand.vmem [shape: f32[98], index: 0, kind: input, shape index: {}]   ;;  %s2540_s1 = inlined_call_operand.<no memory space> [shape: f32[1], index: 1, kind: input, shape index: {}]   ;;  %s2541_s2 = inlined_call_operand.hbm [shape: f32[7,256], index: 2, kind: input, shape index: {}]   ;;  %s2542_s3 = inlined_call_operand.hbm [shape: f32[2,4,256], index: 3, kind: input, shape index: {}]   ;;  %s2543_s4 = inlined_call_operand.hbm [shape: f32[2,4,256], index: 4, kind: output, shape index: {}]  }
   0x1   :  { %2558 = sst [smem:[#allocation17_spill]] %s2539_s0 }
   0x2   :  { %2559 = sst [smem:[#allocation18_spill]] %s2541_s2 }
   0x3   :  { %2560 = sst [smem:[#allocation19_spill]] %s2542_s3 }
   0x4   :  { %9 = sst [smem:[#allocation3]] %s2540_s1 }
   0x5   :  { %10 = vsyncpa [#allocation7], 0 }
   0x6   :  { %11 = vsyncpa [#allocation5], 0 }
   0x7   :  { %12 = vsyncpa [#allocation10], 0 }
   0x8   :  { %14 = vsyncpa [#allocation10 + $0x1], 0 }
   0x9   :  { %15 = vsyncpa [#allocation6], 0 }
   0xa   :  { %17 = vsyncpa [#allocation6 + $0x1], 0  ;;  %s1709_s17 = smov 0   ;;  %s1711_s18 = smov 0  }
   0xb   :  { %s1713_s19 = smov 0   ;;  %s1715_s20 = smov 0  }
   0xc LB: > { %s1730_s1 = sadd.s32 4294967295, %s1654_s20   ;;  %s1292_s21 = sadd.s32 4294967294, %s1654_s20   ;;  %s1654_s20 = sphi %s1715_s20, %s2590_s20   ;;  %s1650_s19 = sphi %s1713_s19, %s2589_s19   ;;  %s1646_s18 = sphi %s1711_s18, %s2588_s18   ;;  %s1642_s17 = sphi %s1709_s17, %s2587_s17  }
   0xd   : > { %p106_p0 = scmp.ne.s32.totalorder %s1646_s18, %s1642_s17  ;;  %p2544_p1 = scmp.eq.s32.totalorder %s1730_s1, 0 }
   0xe   : > { %p136_p3 = scmp.eq.s32.totalorder %s1292_s21, 1  ;;  %p1293_p5 = scmp.ge.s32.totalorder %s1654_s20, 1 }
   0xf   : > { %p1739_p4 = por %p2544_p1, %p106_p0  ;;  %p143_p7 = scmp.lt.s32.totalorder %s1654_s20, 3 }
  0x10   : > { %p1744_p6 = por %p136_p3, %p106_p0  ;;  %s2563_s0 = sld [smem:[#allocation17_spill]] }
  0x11   : > { %s2561_s22 = scalar_select %p1739_p4, 1, 0 }
  0x12   : > { %s2562_s23 = scalar_select %p1744_p6, 1, 0 }
  0x13   : > { %p1752_p8 = pnand %p1293_p5, %p143_p7  ;;  %s1656_s28 = smov [#allocation8]  }
  0x14   : > { %s170_s29 = sshll.u32 %s1656_s28, 4  ;;  %s1768_s5 = sadd.s32 1, %s1654_s20   ;;  %s1765_s29 = int_to_ptr.vmem [resolvable:$true] %s170_s29 }
  0x15   : > { %p1422_p10 = pneg %p1752_p8  ;;  %s90_s6 = ssub.s32 %s1654_s20, %s1768_s5 }
  0x16   : > { %s156_s26 = sshll.u32 %s2563_s0, 4  ;;  %s157_s26 = int_to_ptr.vmem [resolvable:$true] %s156_s26 }
  0x17   : > { %p1761_p11 = pnand %p1422_p10, %p2544_p1  ;;  %s1507_s7 = scalar_lea.vmem %s157_s26, 16 }
  0x18   : > { %p1508_p12 = scmp.ne.s32.totalorder %s157_s26, %s1507_s7  ;;  %p1515_p5 = scmp.lt.s32.totalorder %s157_s26, %s157_s26 }
  0x19   : > { %p1509_p13 = pneg %p1761_p11  ;;  %p1516_p7 = scmp.lt.s32.totalorder %s1507_s7, %s1507_s7 }
  0x1b   : > { %p1510_p0 = pnand %p1509_p13, %p1508_p12  ;;  %p1517_p10 = por %p1516_p7, %p1515_p5 }
  0x1d   : > { %p1511_p3 = pneg %p1510_p0 }
  0x1f   : > { %p1518_p9 = pnand %p1517_p10, %p1511_p3 }
  0x21   : > { %1521 = shalt.err (!%p1518_p9)
}
  0x22   : > { %s1657_s8 = smov [#allocation4]   ;;  %s2566_s2 = sld [smem:[#allocation18_spill]] }
  0x23   : > { %1425 = dma.vmem_to_smem (!%p1761_p11), %s157_s26, 16, %s1657_s8, [#allocation7]  }
  0x28   : > { %s1522_s11 = scalar_lea.hbm %s2566_s2, 256 }
  0x29   : > { %p1523_p1 = scmp.ne.s32.totalorder %s2566_s2, %s1522_s11  ;;  %p1529_p9 = scmp.lt.u32.totalorder %s1522_s11, %s2566_s2 }
  0x2b   : > { %p1525_p12 = pnand %p1523_p1, %p1509_p13 }
  0x2d   : > { %p1526_p0 = pneg %p1525_p12 }
  0x2f   : > { %p1531_p3 = pnand %p1529_p9, %p1526_p0 }
  0x31   : > { %1534 = shalt.err (!%p1531_p3)
}
  0x32   : > { %s1535_s16 = scalar_lea.vmem %s1765_s29, 256  ;;  %p1543_p2 = scmp.lt.s32.totalorder %s1765_s29, %s1765_s29 }
  0x33   : > { %p1536_p5 = scmp.ne.s32.totalorder %s1765_s29, %s1535_s16  ;;  %p1544_p1 = scmp.lt.s32.totalorder %s1535_s16, %s1535_s16 }
  0x35   : > { %p1538_p7 = pnand %p1536_p5, %p1509_p13  ;;  %p1545_p12 = por %p1544_p1, %p1543_p2 }
  0x37   : > { %p1539_p10 = pneg %p1538_p7 }
  0x39   : > { %p1546_p6 = pnand %p1545_p12, %p1539_p10 }
  0x3b   : > { %1549 = shalt.err (!%p1546_p6)
}
  0x3c   : > { %1428 = dma.hbm_to_vmem [thread:$0]  (!%p1761_p11), %s2566_s2, 256, %s1765_s29, [#allocation5]  }
  0x3d   : > { %p91_p2 = scmp.eq.s32.totalorder %s90_s6, 0  ;;  %s93_s25 = sadd.s32 1, %s1650_s19 }
  0x3e   : > { %p100_p6 = scmp.ne.s32.totalorder %s1650_s19, %s1646_s18  ;;  %p101_p13 = scmp.eq.s32.totalorder %s1654_s20, 0 }
  0x3f   : > { %s1812_s26 = scalar_select %p91_p2, %s1650_s19, %s93_s25  }
  0x40   : > { %p102_p0 = por %p101_p13, %p100_p6  ;;  %p2568_p9 = scmp.eq.s32.totalorder %s1730_s1, 1 }
  0x41   : > { %2567 = sst [smem:[#allocation16_spill]] %s1812_s26  ;;  %p1439_p5 = scmp.lt.s32.totalorder %s1654_s20, 2 }
  0x42   : > { %p1816_p3 = por %p2568_p9, %p100_p6  ;;  %s181_s30 = sand.u32 1, %s1650_s19  }
  0x43   : > { %s1297_s7 = sshll.u32 %s181_s30, 3  ;;  %s1408_s8 = sshll.u32 %s1654_s20, 7 }
  0x44   : > { %s2569_s28 = scalar_select %p1816_p3, 1, 0 }
  0x45   : > { %s2570_s3 = sld [smem:[#allocation19_spill]]  ;;  %s185_s6 = scalar_lea.vmem [#allocation9], %s1297_s7 }
  0x46   : > { %s193_s11 = sshll.u32 %s185_s6, 4  ;;  %p1830_p11 = pnand %p1439_p5, %p102_p0  ;;  %s1828_s11 = int_to_ptr.vmem [resolvable:$true] %s193_s11 }
  0x47   : > { %s182_s13 = scalar_lea.sflag [#allocation10], %s181_s30 }
  0x48   : > { %p1552_p10 = pneg %p1830_p11 }
  0x4b   : > { %s1826_s29 = scalar_lea.hbm %s2570_s3, %s1408_s8  ;;  %s1555_s21 = scalar_lea.hbm %s2570_s3, 256 }
  0x4c   : > { %s1550_s14 = scalar_lea.hbm %s1826_s29, 128  ;;  %p1556_p2 = scmp.lt.u32.totalorder %s1826_s29, %s2570_s3 }
  0x4d   : > { %p1551_p7 = scmp.ne.s32.totalorder %s1826_s29, %s1550_s14  ;;  %p1557_p6 = scmp.lt.u32.totalorder %s1555_s21, %s1550_s14 }
  0x4e   : > { %p1559_p0 = scmp.lt.u32.totalorder %s1550_s14, %s1826_s29 }
  0x4f   : > { %p1553_p1 = pnand %p1552_p10, %p1551_p7  ;;  %p1558_p13 = por %p1557_p6, %p1556_p2 }
  0x51   : > { %p1554_p12 = pneg %p1553_p1  ;;  %p1560_p9 = por %p1559_p0, %p1558_p13 }
  0x53   : > { %p1561_p5 = pnand %p1560_p9, %p1554_p12 }
  0x55   : > { %1564 = shalt.err (!%p1561_p5)
}
  0x56   : > { %s1565_s30 = scalar_lea.vmem %s1828_s11, 128  ;;  %s1658_s7 = smov [#allocation9]  }
  0x57   : > { %p1566_p7 = scmp.ne.s32.totalorder %s1828_s11, %s1565_s30  ;;  %s1570_s8 = sshll.u32 %s1658_s7, 4  ;;  %s1571_s8 = int_to_ptr.vmem [resolvable:$false] %s1570_s8 }
  0x58   : > { %s1572_s9 = scalar_lea.vmem %s1571_s8, 256  ;;  %p1573_p4 = scmp.lt.s32.totalorder %s1828_s11, %s1571_s8 }
  0x59   : > { %p1568_p1 = pnand %p1566_p7, %p1552_p10  ;;  %p1574_p2 = scmp.lt.s32.totalorder %s1572_s9, %s1565_s30 }
  0x5b   : > { %p1569_p3 = pneg %p1568_p1  ;;  %p1575_p6 = por %p1574_p2, %p1573_p4 }
  0x5d   : > { %p1576_p13 = pnand %p1575_p6, %p1569_p3 }
  0x5f   : > { %1579 = shalt.err (!%p1576_p13)
}
  0x60   : > { %1432 = dma.hbm_to_vmem [thread:$0]  (!%p1830_p11), %s1826_s29, 128, %s1828_s11, %s182_s13  }
  0x61   : > { %202 = sbr.rel (%p1752_p8) target bundleno = 638 (0x27e), region = 36  ;;  %p2572_p10 = scmp.eq.s32.totalorder (!%p1752_p8), %s1730_s1, 0 }
  0x68   : > { %1625 = dma.done.wait (%p2572_p10), [#allocation7], 16   ;;  %p2573_p12 = pmov %p2572_p10 }
  0x69   : > { %p2574_p0 = pmov %p2572_p10 }
  0x6a   : > { %1627 = vsyncadd (%p2573_p12), [#allocation7], 4294967280 }
  0x6b   : > { %1629 = dma.done.wait (%p2574_p0), [#allocation5], 256   ;;  %p2575_p4 = pmov %p2574_p0 }
  0x6c   : > { %s1870_s10 = sand.u32 1, %s1646_s18   ;;  %p2576_p8 = scmp.ne.s32.totalorder %s2561_s22, 0 }
  0x6d   : > { %1631 = vsyncadd (%p2575_p4), [#allocation5], 4294967040  ;;  %s2547_s27 = sshll.u32 %s1870_s10, 3  ;;  %s213_s29 = scalar_lea.sflag [#allocation10], %s1870_s10 }
  0x6e   : > { %s1876_s6 = scalar_lea.vmem [#allocation9], %s2547_s27 }
  0x6f   : > { %1633 = dma.done.wait (%p2576_p8), %s213_s29, 128  }
  0x70   : > { %1635 = vsyncadd (%p2576_p8), %s213_s29, 4294967168 }
  0x71   : > { %221 = sfence }
  0x72   : > { %v242_v0 = vlaneseq  ;;  %v250_v1 = vld [vmem:[%s1876_s6] sm:$0xff]  ;;  %vm254_vm0 = vcmask 1043456   ;;  %v1659_v7 = vmov 0.0   ;;  %v1660_v14 = vmov 1966171168   ;;  %s1893_s22 = sld [smem:[#allocation4 + $0x9]] }
  0x73   : > { %v252_v2 = vcombine.high %v250_v1, %v250_v1  ;;  %v255_v3 = vsel %vm254_vm0, %v250_v1, -inf  ;;  %v269_v4 = vsel %vm254_vm0, %v250_v1, 0.0  ;;  %v289_v15 = vunpack.c.l.s4 %v1660_v14  ;;  %s1895_s11 = sld [smem:[#allocation4 + $0x3a]]  ;;  %s1320_s12 = sld [smem:[#allocation4 + $0x8]] }
  0x74   : > { %vm244_vm1 = vcmp.lt.s32.totalorder %v242_v0, 128  ;;  %v256_v5 = vrot.slane %v255_v3, 4  ;;  %v270_v6 = vrot.slane %v269_v4, 4  ;;  %v1887_v25 = vshrl.u32 %v242_v0, 7  ;;  %s1897_s13 = sld [smem:[#allocation4 + $0x39]]  ;;  %s1324_s14 = sld [smem:[#allocation4 + $0x16]] }
  0x75   : > { %246 = vst.msk [vmem:[#allocation2] sm:$0x1] %vm244_vm1, %v1659_v7  ;;  %247 = vst.msk [vmem:[#allocation2 + $0x4] sm:$0x1] %vm244_vm1, %v1659_v7  ;;  %v262_v8 = vsel %vm254_vm0, %v252_v2, -inf  ;;  %v276_v9 = vsel %vm254_vm0, %v252_v2, 0.0  ;;  %v290_v24 = vunpack.c.0.s8 %v289_v15 }
  0x76   : > { %248 = vst.msk [vmem:[#allocation2 + $0x3] sm:$0x1] %vm244_vm1, %v1659_v7  ;;  %249 = vst.msk [vmem:[#allocation2 + $0x7] sm:$0x1] %vm244_vm1, %v1659_v7  ;;  %v257_v10 = vmax.f32 %v255_v3, %v256_v5  ;;  %v263_v11 = vrot.slane %v262_v8, 4  ;;  %v271_v12 = vadd.f32 %v270_v6, %v269_v4  ;;  %v277_v13 = vrot.slane %v276_v9, 4 }
  0x77   : > { %v1890_v37 = vsub.s32 %v290_v24, %v1887_v25  ;;  %vm303_vm2 = vcmp.lt.s32.totalorder %v242_v0, 256  ;;  %s1322_s15 = sld [smem:[#allocation4 + $0xf]]  ;;  %s1903_s21 = sld [smem:[#allocation4 + $0x40]]  ;;  %vm350_vm3 = vcmask 916480   ;;  %vm365_vm4 = vcmask 785408  }
  0x78   : > { %v258_v16 = vrot.slane %v257_v10, 2  ;;  %v264_v17 = vmax.f32 %v262_v8, %v263_v11  ;;  %v272_v18 = vrot.slane %v271_v12, 2  ;;  %v278_v19 = vadd.f32 %v277_v13, %v276_v9  ;;  %s1901_s16 = sld [smem:[#allocation4 + $0x47]]  ;;  %s1906_s24 = sld [smem:[#allocation4 + $0xa]] }
  0x79   : > { %s1908_s25 = sld [smem:[#allocation4 + $0x3b]]  ;;  %s1910_s30 = sld [smem:[#allocation4 + $0x10]]  ;;  %v584_v45 = vstv %s1893_s22  ;;  %v466_v46 = vstv %s1320_s12  ;;  %v587_v50 = vstv %s1895_s11  ;;  %vm380_vm5 = vcmask 654336  }
  0x7a   : > { %v259_v20 = vmax.f32 %v257_v10, %v258_v16  ;;  %v265_v21 = vrot.slane %v264_v17, 2  ;;  %v273_v22 = vadd.f32 %v272_v18, %v271_v12  ;;  %v279_v23 = vrot.slane %v278_v19, 2  ;;  %s1912_s7 = sld [smem:[#allocation4 + $0x41]]  ;;  %s1914_s8 = sld [smem:[#allocation4 + $0x17]] }
  0x7b   : > { %s1916_s9 = sld [smem:[#allocation4 + $0x48]]  ;;  %s1919_s29 = sld [smem:[#allocation4 + $0x1d]]  ;;  %v494_v47 = vstv %s1324_s14  ;;  %v469_v52 = vstv %s1897_s13  ;;  %vm397_vm6 = vcmask 523264   ;;  %vm412_vm7 = vcmask 392192  }
  0x7c   : > { %v260_v26 = vrot.slane %v259_v20, 1  ;;  %v266_v27 = vmax.f32 %v264_v17, %v265_v21  ;;  %v274_v28 = vrot.slane %v273_v22, 1  ;;  %v280_v29 = vadd.f32 %v279_v23, %v278_v19  ;;  %s1921_s27 = sld [smem:[#allocation4 + $0x4e]]  ;;  %s1942_s22 = sld [smem:[#allocation4 + $0xb]] }
  0x7d   : > { %v480_v48 = vstv %s1322_s15  ;;  %v483_v54 = vstv %s1903_s21  ;;  %s1952_s11 = sld [smem:[#allocation4 + $0x3c]]  ;;  %s1955_s12 = sld [smem:[#allocation4 + $0x11]]  ;;  %vm427_vm8 = vcmask 261120   ;;  %vm562_vm9 = vcmask 637952  }
  0x7e   : > { %v261_v30 = vmax.f32 %v259_v20, %v260_v26  ;;  %v267_v31 = vrot.slane %v266_v27, 1  ;;  %v275_v32 = vadd.f32 %v274_v28, %v273_v22  ;;  %v281_v33 = vrot.slane %v280_v29, 1  ;;  %s1957_s13 = sld [smem:[#allocation4 + $0x42]]  ;;  %s1961_s14 = sld [smem:[#allocation4 + $0x1e]] }
  0x7f   : > { %v497_v53 = vstv %s1901_s16  ;;  %v695_v57 = vstv %s1906_s24  ;;  %v698_v62 = vstv %s1908_s25  ;;  %v598_v63 = vstv %s1910_s30  ;;  %s1967_s15 = sld [smem:[#allocation4 + $0x4f]]  ;;  %s2554_s16 = smov 112  }
  0x80   : > { %v268_v34 = vmax.f32 %v266_v27, %v267_v31  ;;  %v282_v35 = vadd.f32 %v281_v33, %v280_v29  ;;  %v283_v36 = vmul.f32 0.25, %v275_v32  ;;  %v601_v6 = vstv %s1912_s7  ;;  %s1977_s21 = sld [smem:[#allocation4 + $0x24]]  ;;  %s1979_s24 = sld [smem:[#allocation4 + $0x55]] }
  0x81   : > { %v612_v9 = vstv %s1914_s8  ;;  %v615_v10 = vstv %s1916_s9  ;;  %v510_v14 = vstv %s1919_s29  ;;  %s1981_s25 = sld [smem:[#allocation4 + $0x12]]  ;;  %s1983_s30 = sld [smem:[#allocation4 + $0x43]]  ;;  %vm673_vm10 = vcmask 646144  }
  0x82   : > { %v284_v38 = vmul.f32 0.25, %v282_v35  ;;  %v287_v39 = vcombine.low %v261_v30, %v268_v34  ;;  %v513_v20 = vstv %s1921_s27  ;;  %s1989_s27 = sld [smem:[#allocation4 + $0x18]]  ;;  %s2548_s7 = smov 80   ;;  %v807_v29 = vstv %s1942_s22 }
  0x83   : > { %s2550_s8 = smov 96   ;;  %s1996_s9 = sld [smem:[#allocation4 + $0x49]]  ;;  %v810_v31 = vstv %s1952_s11  ;;  %v709_v32 = vstv %s1955_s12  ;;  %vm910_vm11 = vcmask 662528   ;;  %vm1028_vm12 = vcmask 670720  }
  0x84   : > { %v294_v40 = vrot.slane %v287_v39, %v1890_v37  ;;  %v308_v41 = vcombine.low %v283_v36, %v284_v38  ;;  %v712_v33 = vstv %s1957_s13  ;;  %v628_v34 = vstv %s1961_s14  ;;  %s2004_s29 = sld [smem:[#allocation4 + $0x2b]]  ;;  %s2008_s22 = sld [smem:[#allocation4 + $0x5c]] }
  0x85   : > { %v631_v39 = vstv %s1967_s15  ;;  %s2022_s11 = sld [smem:[#allocation4 + $0x3d]]  ;;  %s2025_s12 = sld [smem:[#allocation4 + $0x1f]]  ;;  %vm1139_vm13 = vcmask 678912   ;;  %vm451_vm14 = vcmask 629760   ;;  %vm570_vm15 = vcmask 1039360  }
  0x86   : > { %v301_v42 = vrot.slane %v294_v40, %v1890_v37  ;;  %v315_v43 = vrot.slane %v308_v41, %v1890_v37  ;;  %s2027_s13 = sld [smem:[#allocation4 + $0x50]]  ;;  %s2031_s14 = sld [smem:[#allocation4 + $0x25]]  ;;  %vm681_vm1 = vcmask 1031168  }
  0x87   : > { %s2033_s15 = sld [smem:[#allocation4 + $0x56]]  ;;  %s2075_s2 = sld [smem:[#allocation4 + $0x2c]] }
  0x88   : > { %305 = vst.msk [vmem:[#allocation2 + $0x1] sm:$0x3] %vm303_vm2, %v301_v42  ;;  %v322_v44 = vrot.slane %v315_v43, %v1890_v37  ;;  %s2058_s0 = sld [smem:[#allocation4 + $0x3e]]  ;;  %s2139_s3 = sld [smem:[#allocation4 + $0x5]] }
  0x89   : > { %s2155_s26 = sld [smem:[#allocation4 + $0x51]]  ;;  %p2583_p11 = scmp.ne.s32.totalorder %s2569_s28, 0 }
  0x8a   : > { %325 = vst.msk [vmem:[#allocation2 + $0x5] sm:$0x3] %vm303_vm2, %v322_v44  ;;  %vm793_vm2 = vcmask 1022976  }
  0x8f   : > { %v1923_v49 = vld [vmem:[#allocation2] sm:$0x7] }
  0x90   : > { %v1926_v51 = vld [vmem:[#allocation2] sm:$0x7]  ;;  %v585_v55 = vmul.f32 %v584_v45, %v1923_v49  ;;  %v599_v13 = vmul.f32 %v598_v63, %v1923_v49  ;;  %v613_v21 = vmul.f32 %v612_v9, %v1923_v49  ;;  %v524_v45 = vstv %s1977_s21  ;;  %s2039_s21 = sld [smem:[#allocation4 + $0x13]] }
  0x91   : > { %v467_v56 = vmul.f32 %v466_v46, %v1926_v51  ;;  %v1934_v58 = vld [vmem:[#allocation2 + $0x4] sm:$0x7]  ;;  %v495_v60 = vmul.f32 %v494_v47, %v1926_v51  ;;  %v481_v61 = vmul.f32 %v480_v48, %v1926_v51  ;;  %v1948_v4 = vld [vmem:[#allocation2] sm:$0x7]  ;;  %v527_v46 = vstv %s1979_s24  ;;  %s2577_s24 = smov 80  }
  0x92   : > { %v1936_v59 = vld [vmem:[#allocation2 + $0x4] sm:$0x7]  ;;  %v588_v0 = vmul.f32 %v587_v50, %v1934_v58  ;;  %v696_v11 = vmul.f32 %v695_v57, %v1948_v4  ;;  %v602_v17 = vmul.f32 %v601_v6, %v1934_v58  ;;  %v1972_v18 = vld [vmem:[#allocation2 + $0x1] sm:$0x7]  ;;  %v616_v22 = vmul.f32 %v615_v10, %v1934_v58 }
  0x93   : > { %v470_v1 = vmul.f32 %v469_v52, %v1936_v59  ;;  %v498_v2 = vmul.f32 %v497_v53, %v1936_v59  ;;  %v484_v3 = vmul.f32 %v483_v54, %v1936_v59  ;;  %v1950_v5 = vld [vmem:[#allocation2 + $0x4] sm:$0x7]  ;;  %v511_v23 = vmul.f32 %v510_v14, %v1972_v18  ;;  %v1993_v28 = vld [vmem:[#allocation2] sm:$0x7] }
  0x94   : > { %v589_v7 = vadd.f32 %v588_v0, %v585_v55  ;;  %v699_v12 = vmul.f32 %v698_v62, %v1950_v5  ;;  %v1974_v19 = vld [vmem:[#allocation2 + $0x5] sm:$0x7]  ;;  %v603_v27 = vadd.f32 %v602_v17, %v599_v13  ;;  %v617_v35 = vadd.f32 %v616_v22, %v613_v21  ;;  %v2017_v43 = vld [vmem:[#allocation2 + $0x1] sm:$0x7] }
  0x95   : > { %v471_v8 = vadd.f32 %v470_v1, %v467_v56  ;;  %v499_v15 = vadd.f32 %v498_v2, %v495_v60  ;;  %v485_v16 = vadd.f32 %v484_v3, %v481_v61  ;;  %v514_v24 = vmul.f32 %v513_v20, %v1974_v19  ;;  %v1998_v30 = vld [vmem:[#allocation2 + $0x4] sm:$0x7]  ;;  %v722_v60 = vld [vmem:[#allocation2 + $0x1] sm:$0x3] }
  0x96   : > { %591 = vrot.lane.b32.xlu1 %v589_v7, %s2554_s16  ;;  %v700_v26 = vadd.f32 %v699_v12, %v696_v11  ;;  %v808_v38 = vmul.f32 %v807_v29, %v1993_v28  ;;  %v811_v40 = vmul.f32 %v810_v31, %v1998_v30  ;;  %v710_v41 = vmul.f32 %v709_v32, %v1948_v4  ;;  %v2019_v44 = vld [vmem:[#allocation2 + $0x5] sm:$0x7]  ;;  %v2061_v10 = vld [vmem:[#allocation2] sm:$0x7] }
  0x97   : > { %473 = vrot.lane.b32.xlu0 %v471_v8, %s2554_s16  ;;  %v515_v36 = vadd.f32 %v514_v24, %v511_v23  ;;  %v713_v42 = vmul.f32 %v712_v33, %v1950_v5  ;;  %v821_v47 = vstv %s1981_s25  ;;  %v824_v48 = vstv %s1983_s30  ;;  %v723_v61 = vld [vmem:[#allocation2 + $0x5] sm:$0x3]  ;;  %s2045_s25 = sld [smem:[#allocation4 + $0x44]]  ;;  %s2047_s30 = sld [smem:[#allocation4 + $0x19]]  ;;  %v1499_v8 = vld [vmem:[#allocation8] ss:$8 sps:$4 sm:$0xff]  }
  0x98   : > { %v629_v50 = vmul.f32 %v628_v34, %v2017_v43  ;;  %v632_v52 = vmul.f32 %v631_v39, %v2019_v44  ;;  %v525_v53 = vmul.f32 %v524_v45, %v1972_v18  ;;  %v725_v54 = vstv %s1989_s27  ;;  %s2049_s27 = sld [smem:[#allocation4 + $0x4a]]  ;;  %v2063_v11 = vld [vmem:[#allocation2 + $0x4] sm:$0x7]  ;;  %v2078_v23 = vld [vmem:[#allocation2 + $0x1] sm:$0x7] }
  0x99   : > { %v812_v55 = vadd.f32 %v811_v40, %v808_v38  ;;  %v714_v56 = vadd.f32 %v713_v42, %v710_v41  ;;  %v528_v57 = vmul.f32 %v527_v46, %v1974_v19  ;;  %v728_v62 = vstv %s1996_s9  ;;  %s2578_s9 = smov 96   ;;  %v2080_v24 = vld [vmem:[#allocation2 + $0x5] sm:$0x7] }
  0x9a   : > { %501 = vrot.lane.b32.xlu1 %v499_v15, %s2548_s7  ;;  %s2010_s7 = sld [smem:[#allocation4 + $0xc]]  ;;  %v822_v63 = vmul.f32 %v821_v47, %v1993_v28  ;;  %v825_v0 = vmul.f32 %v824_v48, %v1998_v30  ;;  %v726_v1 = vmul.f32 %v725_v54, %v722_v60  ;;  %v729_v2 = vmul.f32 %v728_v62, %v723_v61 }
  0x9b   : > { %487 = vrot.lane.b32.xlu0 %v485_v16, %s2550_s8  ;;  %v633_v3 = vadd.f32 %v632_v52, %v629_v50  ;;  %v529_v6 = vadd.f32 %v528_v57, %v525_v53  ;;  %v538_v7 = vstv %s2004_s29  ;;  %v541_v9 = vstv %s2008_s22  ;;  %s2073_s29 = sld [smem:[#allocation4 + $0x57]]  ;;  %s2556_s22 = smov 48   ;;  %v2127_v52 = vld [vmem:[#allocation2] sm:$0x7]  ;;  %v2129_v53 = vld [vmem:[#allocation2 + $0x4] sm:$0x7] }
  0x9c   : > { %v935_v13 = vstv %s2022_s11  ;;  %v741_v14 = vstv %s2025_s12  ;;  %v744_v15 = vstv %s2027_s13  ;;  %v642_v16 = vstv %s2031_s14  ;;  %s2089_s11 = sld [smem:[#allocation4 + $0x5d]]  ;;  %s2096_s12 = sld [smem:[#allocation4 + $0x1a]] }
  0x9d   : > { %v645_v17 = vstv %s2033_s15  ;;  %v826_v20 = vadd.f32 %v825_v0, %v822_v63  ;;  %v730_v21 = vadd.f32 %v729_v2, %v726_v1  ;;  %v539_v22 = vmul.f32 %v538_v7, %v1972_v18  ;;  %v2091_v18 = vld [vmem:[#allocation2 + $0x1] sm:$0x7]  ;;  %s2098_s13 = sld [smem:[#allocation4 + $0x2]]  ;;  %s2106_s14 = sld [smem:[#allocation4 + $0x33]] }
  0x9e   : > { %702 = vrot.lane.b32.xlu1 %v700_v26, %s2554_s16  ;;  %v946_v26 = vstv %s2039_s21  ;;  %v936_v31 = vmul.f32 %v935_v13, %v2063_v11  ;;  %v949_v32 = vstv %s2045_s25  ;;  %v2094_v33 = vrot.slane %v1499_v8, %v1890_v37  ;;  %s2108_s15 = sld [smem:[#allocation4 + $0x1]]  ;;  %s2114_s21 = sld [smem:[#allocation4 + $0x4b]] }
  0x9f   : > { %605 = vrot.lane.b32.xlu0 %v603_v27, %s2550_s8  ;;  %s2552_s8 = smov 64   ;;  %v542_v27 = vmul.f32 %v541_v9, %v1974_v19  ;;  %v742_v34 = vmul.f32 %v741_v14, %v2078_v23  ;;  %v745_v19 = vmul.f32 %v744_v15, %v2080_v24  ;;  %v840_v38 = vstv %s2049_s27  ;;  %s2116_s25 = sld [smem:[#allocation4 + $0x32]] }
  0xa0   : > { %v932_v12 = vstv %s2010_s7  ;;  %s2579_s7 = smov 64   ;;  %v643_v39 = vmul.f32 %v642_v16, %v2017_v43  ;;  %v646_v40 = vmul.f32 %v645_v17, %v2019_v44  ;;  %v947_v41 = vmul.f32 %v946_v26, %v2061_v10  ;;  %s2123_s27 = sld [smem:[#allocation4 + $0x34]] }
  0xa1   : > { %v933_v29 = vmul.f32 %v932_v12, %v2061_v10  ;;  %v950_v42 = vmul.f32 %v949_v32, %v2063_v11  ;;  %v543_v45 = vadd.f32 %v542_v27, %v539_v22  ;;  %v1053_v54 = vstv %s2058_s0  ;;  %s2143_s0 = sld [smem:[#allocation4 + $0x36]] }
  0xa2   : > { %619 = vrot.lane.b32.xlu1 %v617_v35, %s2577_s24  ;;  %v2102_v35 = vld [vmem:[#allocation2 + $0x5] sm:$0x7]  ;;  %v656_v57 = vstv %s2075_s2  ;;  %v746_v60 = vadd.f32 %v745_v19, %v742_v34  ;;  %v647_v61 = vadd.f32 %v646_v40, %v643_v39  ;;  %v551_v63 = vcombine.high %v2094_v33, %v2094_v33  ;;  %s2580_s2 = smov 112  }
  0xa3   : > { %517 = vrot.lane.b32.xlu0 %v515_v36, %s2552_s8  ;;  %s2056_s8 = sld [smem:[#allocation4 + $0xd]]  ;;  %v837_v36 = vstv %s2047_s30  ;;  %v937_v46 = vadd.f32 %v936_v31, %v933_v29  ;;  %s2121_s30 = sld [smem:[#allocation4 + $0x3]]  ;;  %v841_v50 = vmul.f32 %v840_v38, %v2102_v35  ;;  %v951_v62 = vadd.f32 %v950_v42, %v947_v41  ;;  %v2190_v19 = vld [vmem:[#allocation2 + $0x5] sm:$0x7] }
  0xa4   : > { %v838_v48 = vmul.f32 %v837_v36, %v2091_v18  ;;  %v1054_v1 = vmul.f32 %v1053_v54, %v2129_v53  ;;  %v657_v8 = vmul.f32 %v656_v57, %v2017_v43  ;;  %v577_v9 = vstv %s2098_s13  ;;  %s2171_s13 = sld [smem:[#allocation4 + $0x45]] }
  0xa5   : > { %v962_v12 = vstv %s2096_s12  ;;  %v580_v13 = vstv %s2106_s14  ;;  %v578_v14 = vmul.f32 %v577_v9, %v1923_v49  ;;  %v459_v15 = vstv %s2108_s15  ;;  %s2169_s12 = sld [smem:[#allocation4 + $0x14]]  ;;  %s2186_s14 = sld [smem:[#allocation4 + $0x6]] }
  0xa6   : > { %814 = vrot.lane.b32.xlu1 %v812_v55, %s2554_s16  ;;  %s2067_s16 = sld [smem:[#allocation4 + $0x26]]  ;;  %v965_v16 = vstv %s2114_s21  ;;  %v581_v17 = vmul.f32 %v580_v13, %v1934_v58  ;;  %v460_v43 = vmul.f32 %v459_v15, %v1926_v51  ;;  %v691_v58 = vstv %s2123_s27  ;;  %s2206_s15 = sld [smem:[#allocation4 + $0x58]] }
  0xa7   : > { %716 = vrot.lane.b32.xlu0 %v714_v56, %s2578_s9  ;;  %v758_v56 = vstv %s2073_s29  ;;  %s2153_s29 = sld [smem:[#allocation4 + $0x20]]  ;;  %v692_v27 = vmul.f32 %v691_v58, %v1950_v5  ;;  %v925_v34 = vstv %s2139_s3  ;;  %v928_v38 = vstv %s2143_s0  ;;  %s2204_s3 = sld [smem:[#allocation4 + $0x27]] }
  0xa8   : > { %v759_v7 = vmul.f32 %v758_v56, %v2080_v24  ;;  %v2176_v26 = vadd.f32 %v581_v17, %v578_v14  ;;  %v926_v5 = vmul.f32 %v925_v34, %v2061_v10  ;;  %v929_v40 = vmul.f32 %v928_v38, %v2063_v11  ;;  %s2211_s21 = sld [smem:[#allocation4 + $0x2d]]  ;;  %s2229_s27 = sld [smem:[#allocation4 + $0x4c]]  ;;  %v2261_v14 = vld [vmem:[#allocation2 + $0x1] sm:$0x7] }
  0xa9   : > { %v1050_v47 = vstv %s2056_s8  ;;  %s2137_s8 = sld [smem:[#allocation4 + $0x35]]  ;;  %v688_v22 = vstv %s2121_s30  ;;  %v854_v10 = vstv %s2155_s26  ;;  %s1667_s30 = smov 78   ;;  %v2237_v57 = vrot.slane %v2094_v33, %v1890_v37 }
  0xaa   : > { %635 = vrot.lane.b32.xlu1 %v633_v3, %s2579_s7  ;;  %v1051_v0 = vmul.f32 %v1050_v47, %v2127_v52  ;;  %v659_v3 = vstv %s2089_s11  ;;  %s2581_s11 = smov 48   ;;  %v689_v51 = vmul.f32 %v688_v22, %v1948_v4  ;;  %s2227_s26 = sld [smem:[#allocation4 + $0x1b]] }
  0xab   : > { %531 = vrot.lane.b32.xlu0 %v529_v6, %s2556_s22  ;;  %s2133_s22 = sld [smem:[#allocation4 + $0x4]]  ;;  %v842_v6 = vadd.f32 %v841_v50, %v838_v48  ;;  %v855_v50 = vmul.f32 %v854_v10, %v2102_v35  ;;  %v1064_v54 = vstv %s2169_s12  ;;  %s2233_s0 = sld [smem:[#allocation4 + $0x52]] }
  0xac   : > { %v755_v55 = vstv %s2067_s16  ;;  %s1666_s16 = smov 32   ;;  %v2192_v36 = vadd.f32 %v692_v27, %v689_v51  ;;  %v1055_v39 = vadd.f32 %v1054_v1, %v1051_v0  ;;  %s2253_s12 = sld [smem:[#allocation4 + $0x5f]] }
  0xad   : > { %v756_v2 = vmul.f32 %v755_v55, %v2078_v23  ;;  %v1067_v55 = vstv %s2171_s13  ;;  %s2271_s13 = sld [smem:[#allocation4 + $0x22]] }
  0xae   : > { %828 = vrot.lane.b32.xlu1 %v826_v20, %s2578_s9  ;;  %v462_v20 = vstv %s2116_s25  ;;  %s2213_s25 = sld [smem:[#allocation4 + $0x5e]] }
  0xaf   : > { %732 = vrot.lane.b32.xlu0 %v730_v21, %s2577_s24  ;;  %v660_v21 = vmul.f32 %v659_v3, %v2019_v44  ;;  %v463_v49 = vmul.f32 %v462_v20, %v1936_v59  ;;  %v803_v32 = vstv %s2137_s8  ;;  %v2188_v59 = vld [vmem:[#allocation2 + $0x1] sm:$0x7]  ;;  %v760_v47 = vadd.f32 %v759_v7, %v756_v2  ;;  %s2231_s8 = sld [smem:[#allocation4 + $0x21]] }
  0xb0   : > { %v804_v4 = vmul.f32 %v803_v32, %v1998_v30  ;;  %v851_v30 = vstv %s2153_s29  ;;  %v963_v42 = vmul.f32 %v962_v12, %v2188_v59  ;;  %v865_v2 = vstv %s2204_s3  ;;  %s2248_s29 = sld [smem:[#allocation4 + $0x2e]]  ;;  %s2279_s3 = sld [smem:[#allocation4 + $0x59]] }
  0xb1   : > { %v800_v29 = vstv %s2133_s22  ;;  %v2181_v31 = vadd.f32 %v463_v49, %v460_v43  ;;  %s2197_s22 = sld [smem:[#allocation4 + $0x37]]  ;;  %v661_v48 = vadd.f32 %v660_v21, %v657_v8  ;;  %v852_v11 = vmul.f32 %v851_v30, %v2091_v18  ;;  %v1501_v30 = vld [vmem:[#allocation8 + $0x4] ss:$8 sps:$4 sm:$0x77]  }
  0xb2   : > { %545 = vrot.lane.b32.xlu1 %v543_v45, %s1666_s16  ;;  %v801_v44 = vmul.f32 %v800_v29, %v1993_v28  ;;  %v2202_v28 = vrot.slane %v551_v63, %v1890_v37  ;;  %v966_v45 = vmul.f32 %v965_v16, %v2190_v19  ;;  %v868_v3 = vstv %s2206_s15  ;;  %v2267_v16 = vld [vmem:[#allocation2 + $0x5] sm:$0x7]  ;;  %s1668_s15 = smov 79  }
  0xb3   : > { %939 = vrot.lane.b32.xlu0 %v937_v46, %s2580_s2  ;;  %v2219_v46 = vadd.f32 %v929_v40, %v926_v5  ;;  %v856_v1 = vadd.f32 %v855_v50, %v852_v11  ;;  %v669_v8 = vcombine.high %v2237_v57, %v2237_v57  ;;  %v866_v12 = vmul.f32 %v865_v2, %v2091_v18 }
  0xb4   : > { %v2215_v41 = vadd.f32 %v804_v4, %v801_v44  ;;  %v967_v56 = vadd.f32 %v966_v45, %v963_v42  ;;  %v772_v7 = vstv %s2213_s25  ;;  %v869_v13 = vmul.f32 %v868_v3, %v2102_v35  ;;  %s2290_s25 = sld [smem:[#allocation4 + $0x60]] }
  0xb5   : > { %v773_v15 = vmul.f32 %v772_v7, %v2080_v24  ;;  %v1080_v17 = vstv %s2227_s26  ;;  %v1083_v20 = vstv %s2229_s27  ;;  %v976_v43 = vstv %s2231_s8  ;;  %s2302_s26 = sld [smem:[#allocation4 + $0x5a]]  ;;  %s2308_s27 = sld [smem:[#allocation4 + $0x30]] }
  0xb6   : > { %748 = vrot.lane.b32.xlu1 %v746_v60, %s2579_s7  ;;  %v1043_v60 = vstv %s2186_s14  ;;  %s2273_s14 = sld [smem:[#allocation4 + $0x53]]  ;;  %v979_v21 = vstv %s2233_s0  ;;  %v870_v49 = vadd.f32 %v869_v13, %v866_v12  ;;  %v1084_v24 = vmul.f32 %v1083_v20, %v2267_v16  ;;  %s2310_s8 = sld [smem:[#allocation4 + $0x61]] }
  0xb7   : > { %649 = vrot.lane.b32.xlu0 %v647_v61, %s2581_s11  ;;  %v1065_v61 = vmul.f32 %v1064_v54, %v2127_v52  ;;  %v1044_v63 = vmul.f32 %v1043_v60, %v2127_v52  ;;  %v1046_v0 = vstv %s2197_s22  ;;  %s2277_s22 = sld [smem:[#allocation4 + $0x28]]  ;;  %v977_v58 = vmul.f32 %v976_v43, %v2188_v59  ;;  %s2323_s0 = sld [smem:[#allocation4 + $0x7]] }
  0xb8   : > { %v1047_v33 = vmul.f32 %v1046_v0, %v2129_v53  ;;  %v980_v51 = vmul.f32 %v979_v21, %v2190_v19  ;;  %v879_v27 = vstv %s2248_s29  ;;  %v882_v29 = vstv %s2253_s12  ;;  %s2325_s29 = sld [smem:[#allocation4 + $0x38]]  ;;  %s2329_s12 = sld [smem:[#allocation4 + $0xe]] }
  0xb9   : > { %v880_v32 = vmul.f32 %v879_v27, %v2091_v18  ;;  %v883_v4 = vmul.f32 %v882_v29, %v2102_v35  ;;  %v1094_v5 = vstv %s2271_s13  ;;  %v993_v40 = vstv %s2279_s3  ;;  %s2331_s13 = sld [smem:[#allocation4 + $0x3f]]  ;;  %s2344_s3 = sld [smem:[#allocation4 + $0x1c]] }
  0xba   : > { %953 = vrot.lane.b32.xlu1 %v951_v62, %s2578_s9  ;;  %v1068_v62 = vmul.f32 %v1067_v55, %v2129_v53  ;;  %v2255_v52 = vadd.f32 %v1047_v33, %v1044_v63  ;;  %v981_v34 = vadd.f32 %v980_v51, %v977_v58  ;;  %v782_v18 = vcombine.high %v2202_v28, %v2202_v28 }
  0xbb   : > { %844 = vrot.lane.b32.xlu0 %v842_v6, %s2577_s24  ;;  %v769_v6 = vstv %s2211_s21  ;;  %s2288_s21 = sld [smem:[#allocation4 + $0x2f]]  ;;  %v1095_v10 = vmul.f32 %v1094_v5, %v2261_v14  ;;  %v884_v35 = vadd.f32 %v883_v4, %v880_v32  ;;  %v899_v50 = vrot.slane %v1501_v30, %v1890_v37 }
  0xbc   : > { %v1069_v9 = vadd.f32 %v1068_v62, %v1065_v61  ;;  %v770_v53 = vmul.f32 %v769_v6, %v2078_v23  ;;  %v1081_v23 = vmul.f32 %v1080_v17, %v2261_v14  ;;  %v1097_v38 = vstv %s2273_s14  ;;  %s2336_s14 = sld [smem:[#allocation4 + $0x15]] }
  0xbd   : > { %v1098_v42 = vmul.f32 %v1097_v38, %v2267_v16  ;;  %v1111_v61 = vstv %s2302_s26  ;;  %v906_v62 = vrot.slane %v899_v50, %v1890_v37  ;;  %v1017_v63 = vcombine.high %v899_v50, %v899_v50  ;;  %s2360_s26 = sld [smem:[#allocation4 + $0x2a]] }
  0xbe   : > { %559 = vrot.lane.b32.xlu1 %v2202_v28, %s1667_s30  ;;  %v774_v22 = vadd.f32 %v773_v15, %v770_v53  ;;  %v1085_v44 = vadd.f32 %v1084_v24, %v1081_v23  ;;  %s2300_s30 = sld [smem:[#allocation4 + $0x29]]  ;;  %v1122_v0 = vstv %s2308_s27  ;;  %v1112_v2 = vmul.f32 %v1111_v61, %v2267_v16  ;;  %s2362_s27 = sld [smem:[#allocation4 + $0x5b]]  ;;  %v384_v23 = vld [vmem:[#allocation2 + $0x1] sm:$0x7]  ;;  %v385_v24 = vld [vmem:[#allocation2 + $0x5] sm:$0x7] }
  0xbf   : > { %1057 = vrot.lane.b32.xlu0 %v1055_v39, %s2580_s2  ;;  %v990_v39 = vstv %s2277_s22  ;;  %v1099_v11 = vadd.f32 %v1098_v42, %v1095_v10  ;;  %s2338_s22 = sld [smem:[#allocation4 + $0x46]]  ;;  %v1123_v3 = vmul.f32 %v1122_v0, %v2261_v14  ;;  %v1024_v6 = vrot.slane %v1017_v63, %v1890_v37 }
  0xc0   : > { %v991_v45 = vmul.f32 %v990_v39, %v2188_v59  ;;  %v340_v12 = vstv %s2323_s0  ;;  %v343_v13 = vstv %s2325_s29  ;;  %v358_v53 = vstv %s2331_s13  ;;  %s1670_s0 = smov 82   ;;  %s1671_s29 = smov 83  }
  0xc1   : > { %v1004_v28 = vstv %s2288_s21  ;;  %s2350_s21 = sld [smem:[#allocation4 + $0x23]]  ;;  %v1135_v15 = vcombine.high %v906_v62, %v906_v62  ;;  %s328_s13 = sld [smem:[#allocation3]] }
  0xc2   : > { %762 = vrot.lane.b32.xlu1 %v760_v47, %s2581_s11  ;;  %v994_v47 = vmul.f32 %v993_v40, %v2190_v19  ;;  %v1005_v55 = vmul.f32 %v1004_v28, %v2188_v59  ;;  %v370_v20 = vstv %s2336_s14  ;;  %s1679_s14 = smov 51  }
  0xc3   : > { %663 = vrot.lane.b32.xlu0 %v661_v48, %s1666_s16  ;;  %v1007_v48 = vstv %s2290_s25  ;;  %s2352_s25 = sld [smem:[#allocation4 + $0x54]]  ;;  %v417_v40 = vstv %s2360_s26 }
  0xc4   : > { %v995_v54 = vadd.f32 %v994_v47, %v991_v45  ;;  %v1108_v60 = vstv %s2300_s30  ;;  %s1669_s30 = smov 81   ;;  %v420_v30 = vstv %s2362_s27 }
  0xc5   : > { %v373_v43 = vstv %s2338_s22  ;;  %s1409_s22 = sshll.u32 %s1730_s1, 7  ;;  %s1184_s1 = scalar_lea.sflag [#allocation6], %s1870_s10 }
  0xc6   : > { %969 = vrot.lane.b32.xlu1 %v967_v56, %s2577_s24  ;;  %v1008_v56 = vmul.f32 %v1007_v48, %v2190_v19  ;;  %v1109_v19 = vmul.f32 %v1108_v60, %v2261_v14  ;;  %v355_v14 = vstv %s2329_s12  ;;  %v418_v48 = vmul.f32 %v417_v40, %v384_v23  ;;  %s1672_s12 = smov 77   ;;  %s2495_s27 = scalar_lea.hbm %s2543_s4, %s1409_s22 }
  0xc7   : > { %858 = vrot.lane.b32.xlu0 %v856_v1, %s2579_s7  ;;  %v1125_v1 = vstv %s2310_s8  ;;  %s2364_s8 = sld [smem:[#allocation4]]  ;;  %v402_v32 = vstv %s2350_s21 }
  0xc8   : > { %v1009_v59 = vadd.f32 %v1008_v56, %v1005_v55  ;;  %v1126_v33 = vmul.f32 %v1125_v1, %v2267_v16  ;;  %v1113_v7 = vadd.f32 %v1112_v2, %v1109_v19  ;;  %v403_v45 = vmul.f32 %v402_v32, %v384_v23 }
  0xca   : > { %670 = vrot.lane.b32.xlu1 %v669_v8, %s1668_s15  ;;  %s2346_s15 = sld [smem:[#allocation4 + $0x4d]]  ;;  %v330_v8 = vld [vmem:[#allocation2] sm:$0x7]  ;;  %v1127_v16 = vadd.f32 %v1126_v33, %v1123_v3 }
  0xcb   : > { %1071 = vrot.lane.b32.xlu0 %v1069_v9, %s2578_s9  ;;  %v331_v9 = vld [vmem:[#allocation2 + $0x4] sm:$0x7]  ;;  %v341_v37 = vmul.f32 %v340_v12, %v330_v8  ;;  %v356_v21 = vmul.f32 %v355_v14, %v330_v8  ;;  %v371_v51 = vmul.f32 %v370_v20, %v330_v8 }
  0xcc   : > { %v344_v17 = vmul.f32 %v343_v13, %v331_v9  ;;  %v374_v27 = vmul.f32 %v373_v43, %v331_v9 }
  0xcd   : > { %v333_v38 = vstv %s2364_s8 }
  0xce   : > { %872 = vrot.lane.b32.xlu1 %v870_v49, %s2581_s11  ;;  %v359_v49 = vmul.f32 %v358_v53, %v331_v9  ;;  %v345_v4 = vadd.f32 %v344_v17, %v341_v37  ;;  %v334_v10 = vmul.f32 %v333_v38, %v330_v8  ;;  %v375_v42 = vadd.f32 %v374_v27, %v371_v51 }
  0xcf   : > { %776 = vrot.lane.b32.xlu0 %v774_v22, %s1666_s16  ;;  %v387_v22 = vstv %s2344_s3  ;;  %s2582_s3 = sshll.u32 %s1870_s10, 3 }
  0xd0   : > { %v390_v58 = vstv %s2346_s15  ;;  %v388_v29 = vmul.f32 %v387_v22, %v384_v23  ;;  %v360_v5 = vadd.f32 %v359_v49, %v356_v21  ;;  %s241_s15 = scalar_lea.vmem [#allocation11], %s2582_s3 }
  0xd1   : > { %s1198_s21 = sshll.u32 %s241_s15, 4  ;;  %s2497_s21 = int_to_ptr.vmem [resolvable:$true] %s1198_s21 }
  0xd2   : > { %1087 = vrot.lane.b32.xlu1 %v1085_v44, %s2577_s24  ;;  %v391_v44 = vmul.f32 %v390_v58, %v385_v24  ;;  %s1580_s8 = scalar_lea.vmem %s2497_s21, 128 }
  0xd3   : > { %983 = vrot.lane.b32.xlu0 %v981_v34, %s2579_s7  ;;  %v405_v34 = vstv %s2352_s25  ;;  %p1581_p3 = scmp.ne.s32.totalorder %s2497_s21, %s1580_s8 }
  0xd4   : > { %v406_v28 = vmul.f32 %v405_v34, %v385_v24 }
  0xd5   : > { %p1582_p9 = pnand %p1581_p3, %p2583_p11 }
  0xd6   : > { %886 = vrot.lane.b32.xlu1 %v884_v35, %s1666_s16  ;;  %v392_v35 = vadd.f32 %v391_v44, %v388_v29  ;;  %v407_v50 = vadd.f32 %v406_v28, %v403_v45 }
  0xd7   : > { %783 = vrot.lane.b32.xlu0 %v782_v18, %s2577_s24  ;;  %p1583_p5 = pneg %p1582_p9 }
  0xda   : > { %1101 = vrot.lane.b32.xlu1 %v1099_v11, %s2579_s7  ;;  %v421_v11 = vmul.f32 %v420_v30, %v385_v24 }
  0xdb   : > { %997 = vrot.lane.b32.xlu0 %v995_v54, %s2581_s11 }
  0xdc   : > { %v422_v54 = vadd.f32 %v421_v11, %v418_v48 }
  0xde   : > { %1011 = vrot.lane.b32.xlu1 %v1009_v59, %s1666_s16 }
  0xdf   : > { %907 = vrot.lane.b32.xlu0 %v906_v62, %s1669_s30  ;;  %s1305_s30 = sld [smem:[#allocation4 + $0x31]] }
  0xe2   : > { %1025 = vrot.lane.b32.xlu1 %v1024_v6, %s1670_s0 }
  0xe3   : > { %1115 = vrot.lane.b32.xlu0 %v1113_v7, %s2581_s11 }
  0xe5   : > { %v336_v39 = vstv %s1305_s30  ;;  %s1680_s30 = smov [#allocation11]  }
  0xe6   : > { %1136 = vrot.lane.b32.xlu1 %v1135_v15, %s1671_s29  ;;  %v337_v18 = vmul.f32 %v336_v39, %v331_v9 }
  0xe7   : > { %1129 = vrot.lane.b32.xlu0 %v1127_v16, %s1666_s16 }
  0xe8   : > { %v2377_v47 = vadd.f32 %v337_v18, %v334_v10 }
  0xea   : > { %362 = vrot.lane.b32.xlu1 %v360_v5, %s2578_s9  ;;  %s1674_s9 = smov 126  }
  0xeb   : > { %347 = vrot.lane.b32.xlu0 %v345_v4, %s2580_s2  ;;  %s1677_s2 = smov 123  }
  0xee   : > { %394 = vrot.lane.b32.xlu1 %v392_v35, %s2579_s7  ;;  %s1675_s7 = smov 125  }
  0xef   : > { %377 = vrot.lane.b32.xlu0 %v375_v42, %s2577_s24  ;;  %s1673_s24 = smov 127  }
  0xf2   : > { %424 = vrot.lane.b32.xlu1 %v422_v54, %s1666_s16  ;;  %s1676_s16 = smov 124  }
  0xf3   : > { %409 = vrot.lane.b32.xlu0 %v407_v50, %s2581_s11  ;;  %s1678_s11 = smov 122  }
  0xf7   : > { %448 = vrot.lane.b32.xlu0 %v2237_v57, %s1672_s12 }
 0x108   : > { %v592_v55 = vpop.permute.xlu1 %591 }
 0x109   : > { %v474_v56 = vpop.permute.xlu0 %473  ;;  %v593_v22 = vrot.slane %v592_v55, 1 }
 0x10a   : > { %v475_v33 = vrot.slane %v474_v56, 1 }
 0x10b   : > { %v594_v4 = vsel %vm350_vm3, %v592_v55, %v593_v22 }
 0x10c   : > { %v502_v60 = vpop.permute.xlu1 %501  ;;  %v476_v8 = vsel %vm350_vm3, %v474_v56, %v475_v33  ;;  %v596_v10 = vadd.f32 %v594_v4, %v2176_v26 }
 0x10d   : > { %v488_v61 = vpop.permute.xlu0 %487  ;;  %v478_v14 = vadd.f32 %v476_v8, %v2181_v31  ;;  %v503_v53 = vrot.slane %v502_v60, 1 }
 0x10e   : > { %v489_v7 = vrot.slane %v488_v61, 1 }
 0x10f   : > { %v504_v43 = vsel %vm380_vm5, %v502_v60, %v503_v53 }
 0x110   : > { %v2386_v62 = vpop.permute.xlu1 %702  ;;  %v490_v13 = vsel %vm365_vm4, %v488_v61, %v489_v7 }
 0x111   : > { %v606_v63 = vpop.permute.xlu0 %605  ;;  %v492_v16 = vadd.f32 %v490_v13, %v478_v14  ;;  %v704_v61 = vrot.slane %v2386_v62, 1 }
 0x112   : > { %v607_v27 = vrot.slane %v606_v63, 1 }
 0x113   : > { %v506_v23 = vadd.f32 %v504_v43, %v492_v16 }
 0x114   : > { %v620_v0 = vpop.permute.xlu1 %619  ;;  %v608_v40 = vsel %vm365_vm4, %v606_v63, %v607_v27 }
 0x115   : > { %v518_v1 = vpop.permute.xlu0 %517  ;;  %v621_v5 = vrot.slane %v620_v0, 1  ;;  %v610_v11 = vadd.f32 %v608_v40, %v596_v10 }
 0x116   : > { %v519_v15 = vrot.slane %v518_v1, 7 }
 0x117   : > { %v622_v28 = vsel %vm380_vm5, %v620_v0, %v621_v5 }
 0x118   : > { %v2388_v59 = vpop.permute.xlu1 %814  ;;  %v520_v21 = vsel %vm397_vm6, %v519_v15, %v518_v1  ;;  %v624_v55 = vadd.f32 %v622_v28, %v610_v11 }
 0x119   : > { %v2390_v19 = vpop.permute.xlu0 %716  ;;  %v522_v51 = vadd.f32 %v520_v21, %v506_v23  ;;  %v816_v21 = vrot.slane %v2388_v59, 1 }
 0x11a   : > { %v718_v1 = vrot.slane %v2390_v19, 1 }
 0x11c   : > { %v636_v2 = vpop.permute.xlu1 %635  ;;  %v719_v14 = vsel %vm365_vm4, %v2390_v19, %v718_v1 }
 0x11d   : > { %v532_v3 = vpop.permute.xlu0 %531  ;;  %v637_v30 = vrot.slane %v636_v2, 7 }
 0x11e   : > { %v533_v20 = vrot.slane %v532_v3, 7 }
 0x11f   : > { %v638_v50 = vsel %vm397_vm6, %v637_v30, %v636_v2  ;;  %v705_v2 = vsel %vm350_vm3, %v2386_v62, %v704_v61 }
 0x120   : > { %v2392_v6 = vpop.permute.xlu1 %828  ;;  %v534_v58 = vsel %vm412_vm7, %v533_v20, %v532_v3  ;;  %v640_v63 = vadd.f32 %v638_v50, %v624_v55  ;;  %v707_v16 = vadd.f32 %v705_v2, %v2192_v36 }
 0x121   : > { %v2394_v57 = vpop.permute.xlu0 %732  ;;  %v536_v44 = vadd.f32 %v534_v58, %v522_v51  ;;  %v830_v22 = vrot.slane %v2392_v6, 1 }
 0x122   : > { %v734_v8 = vrot.slane %v2394_v57, 7  ;;  %v721_v23 = vadd.f32 %v719_v14, %v707_v16 }
 0x124   : > { %v546_v9 = vpop.permute.xlu1 %545  ;;  %v735_v62 = vsel %vm380_vm5, %v734_v8, %v2394_v57 }
 0x125   : > { %v2397_v12 = vpop.permute.xlu0 %939  ;;  %v547_v49 = vrot.slane %v546_v9, 7  ;;  %v737_v51 = vadd.f32 %v735_v62, %v721_v23 }
 0x126   : > { %v941_v36 = vrot.slane %v2397_v12, 1 }
 0x127   : > { %v548_v29 = vsel %vm427_vm8, %v547_v49, %v546_v9 }
 0x128   : > { %v2401_v37 = vpop.permute.xlu1 %748  ;;  %v550_v39 = vadd.f32 %v548_v29, %v536_v44  ;;  %v817_v44 = vsel %vm350_vm3, %v2388_v59, %v816_v21  ;;  %v942_v30 = vsel %vm350_vm3, %v2397_v12, %v941_v36 }
 0x129   : > { %v650_v17 = vpop.permute.xlu0 %649  ;;  %v750_v53 = vrot.slane %v2401_v37, 7  ;;  %v819_v40 = vadd.f32 %v817_v44, %v2215_v41  ;;  %v944_v61 = vadd.f32 %v942_v30, %v2219_v46 }
 0x12a   : > { %v651_v48 = vrot.slane %v650_v17, 7 }
 0x12b   : > { %v751_v19 = vsel %vm397_vm6, %v750_v53, %v2401_v37 }
 0x12c   : > { %v2405_v24 = vpop.permute.xlu1 %953  ;;  %v652_v26 = vsel %vm412_vm7, %v651_v48, %v650_v17  ;;  %v753_v4 = vadd.f32 %v751_v19, %v737_v51 }
 0x12d   : > { %v2407_v31 = vpop.permute.xlu0 %844  ;;  %v654_v3 = vadd.f32 %v652_v26, %v640_v63  ;;  %v955_v5 = vrot.slane %v2405_v24, 1 }
 0x12e   : > { %v846_v57 = vrot.slane %v2407_v31, 7 }
 0x130   : > { %v560_v32 = vpop.permute.xlu1 %559 }
 0x131   : > { %v2411_v34 = vpop.permute.xlu0 %1057  ;;  %v561_v38 = vrot.slane %v560_v32, 7 }
 0x132   : > { %v1059_v11 = vrot.slane %v2411_v34, 1 }
 0x133   : > { %v563_v18 = vsel %vm562_vm9, %v561_v38, %v560_v32  ;;  %v831_v38 = vsel %vm365_vm4, %v2392_v6, %v830_v22  ;;  %v956_v6 = vsel %vm365_vm4, %v2405_v24, %v955_v5 }
 0x134   : > { %v565_v42 = vmul.f32 %v563_v18, %v550_v39  ;;  %v763_v35 = vpop.permute.xlu1 %762  ;;  %v833_v48 = vadd.f32 %v831_v38, %v819_v40  ;;  %v958_v2 = vadd.f32 %v956_v6, %v944_v61  ;;  %v1060_v8 = vsel %vm350_vm3, %v2411_v34, %v1059_v11 }
 0x135   : > { %v664_v45 = vpop.permute.xlu0 %663  ;;  %v764_v49 = vrot.slane %v763_v35, 7  ;;  %v1062_v34 = vadd.f32 %v1060_v8, %v2255_v52 }
 0x136   : > { %567 = vrot.lane.b32.xlu1 %v565_v42, %s1673_s24  ;;  %v665_v54 = vrot.slane %v664_v45, 7  ;;  %v847_v42 = vsel %vm380_vm5, %v846_v57, %v2407_v31 }
 0x137   : > { %v765_v32 = vsel %vm412_vm7, %v764_v49, %v763_v35  ;;  %v849_v31 = vadd.f32 %v847_v42, %v833_v48 }
 0x138   : > { %v2418_v56 = vpop.permute.xlu1 %969  ;;  %v666_v0 = vsel %vm427_vm8, %v665_v54, %v664_v45  ;;  %v767_v18 = vadd.f32 %v765_v32, %v753_v4 }
 0x139   : > { %v859_v60 = vpop.permute.xlu0 %858  ;;  %v668_v13 = vadd.f32 %v666_v0, %v654_v3  ;;  %v971_v35 = vrot.slane %v2418_v56, 7 }
 0x13a   : > { %v860_v37 = vrot.slane %v859_v60, 7 }
 0x13b   : > { %v972_v24 = vsel %vm380_vm5, %v971_v35, %v2418_v56 }
 0x13c   : > { %v671_v33 = vpop.permute.xlu1 %670  ;;  %v861_v50 = vsel %vm397_vm6, %v860_v37, %v859_v60  ;;  %v974_v14 = vadd.f32 %v972_v24, %v958_v2 }
 0x13d   : > { %v2424_v7 = vpop.permute.xlu0 %1071  ;;  %v672_v9 = vrot.slane %v671_v33, 7  ;;  %v863_v60 = vadd.f32 %v861_v50, %v849_v31 }
 0x13e   : > { %v1073_v26 = vrot.slane %v2424_v7, 1 }
 0x13f   : > { %v674_v15 = vsel %vm673_vm10, %v672_v9, %v671_v33 }
 0x140   : > { %v676_v17 = vmul.f32 %v674_v15, %v668_v13  ;;  %v873_v20 = vpop.permute.xlu1 %872  ;;  %v1074_v53 = vsel %vm365_vm4, %v2424_v7, %v1073_v26 }
 0x141   : > { %v777_v43 = vpop.permute.xlu0 %776  ;;  %v874_v45 = vrot.slane %v873_v20, 7 }
 0x142   : > { %678 = vrot.lane.b32.xlu0 %v676_v17, %s1674_s9  ;;  %v778_v58 = vrot.slane %v777_v43, 7 }
 0x143   : > { %v875_v3 = vsel %vm412_vm7, %v874_v45, %v873_v20 }
 0x144   : > { %v1088_v27 = vpop.permute.xlu1 %1087  ;;  %v779_v39 = vsel %vm427_vm8, %v778_v58, %v777_v43  ;;  %v877_v56 = vadd.f32 %v875_v3, %v863_v60  ;;  %v1076_v58 = vadd.f32 %v1074_v53, %v1062_v34 }
 0x145   : > { %v984_v29 = vpop.permute.xlu0 %983  ;;  %v781_v41 = vadd.f32 %v779_v39, %v767_v18  ;;  %v1089_v46 = vrot.slane %v1088_v27, 7 }
 0x146   : > { %v985_v12 = vrot.slane %v984_v29, 7 }
 0x147   : > { %v1090_v23 = vsel %vm380_vm5, %v1089_v46, %v1088_v27 }
 0x148   : > { %v887_v59 = vpop.permute.xlu1 %886  ;;  %v986_v9 = vsel %vm397_vm6, %v985_v12, %v984_v29  ;;  %v1092_v4 = vadd.f32 %v1090_v23, %v1076_v58 }
 0x149   : > { %v784_v10 = vpop.permute.xlu0 %783  ;;  %v888_v54 = vrot.slane %v887_v59, 7  ;;  %v988_v62 = vadd.f32 %v986_v9, %v974_v14 }
 0x14a   : > { %v785_v28 = vrot.slane %v784_v10, 7 }
 0x14b   : > { %v889_v13 = vsel %vm427_vm8, %v888_v54, %v887_v59 }
 0x14c   : > { %v786_v55 = vsel %vm380_vm5, %v785_v28, %v784_v10  ;;  %v1102_v1 = vpop.permute.xlu1 %1101  ;;  %v891_v49 = vadd.f32 %v889_v13, %v877_v56 }
 0x14d   : > { %v788_v63 = vmul.f32 %v786_v55, %v781_v41  ;;  %v998_v0 = vpop.permute.xlu0 %997  ;;  %v1103_v17 = vrot.slane %v1102_v1, 7 }
 0x14e   : > { %v999_v33 = vrot.slane %v998_v0, 7 }
 0x14f   : > { %790 = vrot.lane.b32.xlu1 %v788_v63, %s1675_s7  ;;  %v1104_v44 = vsel %vm397_vm6, %v1103_v17, %v1102_v1  ;;  %v329_v17 = vstv %s328_s13 }
 0x150   : > { %v1012_v15 = vpop.permute.xlu1 %1011  ;;  %v1000_v20 = vsel %vm412_vm7, %v999_v33, %v998_v0  ;;  %v1106_v38 = vadd.f32 %v1104_v44, %v1092_v4 }
 0x151   : > { %v908_v16 = vpop.permute.xlu0 %907  ;;  %v1013_v43 = vrot.slane %v1012_v15, 7  ;;  %v1002_v7 = vadd.f32 %v1000_v20, %v988_v62 }
 0x152   : > { %v909_v21 = vrot.slane %v908_v16, 7 }
 0x153   : > { %v1014_v22 = vsel %vm427_vm8, %v1013_v43, %v1012_v15 }
 0x154   : > { %v911_v19 = vsel %vm910_vm11, %v909_v21, %v908_v16  ;;  %v1026_v36 = vpop.permute.xlu1 %1025  ;;  %v1016_v5 = vadd.f32 %v1014_v22, %v1002_v7 }
 0x155   : > { %v913_v51 = vmul.f32 %v911_v19, %v891_v49  ;;  %v1116_v29 = vpop.permute.xlu0 %1115  ;;  %v1027_v57 = vrot.slane %v1026_v36, 7 }
 0x156   : > { %v1117_v32 = vrot.slane %v1116_v29, 7 }
 0x157   : > { %915 = vrot.lane.b32.xlu0 %v913_v51, %s1676_s16  ;;  %v1029_v52 = vsel %vm1028_vm12, %v1027_v57, %v1026_v36 }
 0x158   : > { %v1118_v27 = vsel %vm412_vm7, %v1117_v32, %v1116_v29  ;;  %v1031_v37 = vmul.f32 %v1029_v52, %v1016_v5  ;;  %v1137_v39 = vpop.permute.xlu1 %1136 }
 0x159   : > { %v1130_v40 = vpop.permute.xlu0 %1129  ;;  %v1138_v30 = vrot.slane %v1137_v39, 7  ;;  %v1120_v59 = vadd.f32 %v1118_v27, %v1106_v38 }
 0x15a   : > { %v1131_v18 = vrot.slane %v1130_v40, 7  ;;  %1033 = vrot.lane.b32.xlu1 %v1031_v37, %s1677_s2 }
 0x15b   : > { %v1140_v28 = vsel %vm1139_vm13, %v1138_v30, %v1137_v39 }
 0x15c   : > { %v1132_v10 = vsel %vm427_vm8, %v1131_v18, %v1130_v40  ;;  %v363_v45 = vpop.permute.xlu1 %362  ;;  %v1168_v18 = vsub.s32 2, %v1887_v25 }
 0x15d   : > { %v1134_v42 = vadd.f32 %v1132_v10, %v1120_v59  ;;  %v348_v35 = vpop.permute.xlu0 %347  ;;  %v364_v6 = vrot.slane %v363_v45, 1  ;;  %v1160_v59 = vsub.s32 0, %v1887_v25  ;;  %v1164_v10 = vsub.s32 1, %v1887_v25 }
 0x15e   : > { %v349_v48 = vrot.slane %v348_v35, 1 }
 0x15f   : > { %v1142_v11 = vmul.f32 %v1140_v28, %v1134_v42  ;;  %v366_v50 = vsel %vm365_vm4, %v363_v45, %v364_v6  ;;  %vm1036_vm4 = vcmask 1006592  }
 0x160   : > { %v351_v41 = vsel %vm350_vm3, %v348_v35, %v349_v48  ;;  %v395_v55 = vpop.permute.xlu1 %394  ;;  %vm918_vm3 = vcmask 1014784  }
 0x161   : > { %1144 = vrot.lane.b32.xlu0 %v1142_v11, %s1678_s11  ;;  %v353_v12 = vadd.f32 %v351_v41, %v2377_v47  ;;  %v378_v54 = vpop.permute.xlu0 %377  ;;  %v396_v31 = vrot.slane %v395_v55, 7 }
 0x162   : > { %v379_v61 = vrot.slane %v378_v54, 1 }
 0x163   : > { %v368_v26 = vadd.f32 %v366_v50, %v353_v12  ;;  %v398_v1 = vsel %vm397_vm6, %v396_v31, %v395_v55  ;;  %vm1178_vm6 = vcmask 416768  }
 0x164   : > { %v381_v63 = vsel %vm380_vm5, %v378_v54, %v379_v61  ;;  %v425_v3 = vpop.permute.xlu1 %424  ;;  %vm1147_vm5 = vcmask 998400   ;;  %v1506_v54 = vld [vmem:[%s1876_s6] sm:$0xff]  ;;  %s1584_s6 = sshll.u32 %s1680_s30, 4  ;;  %s1585_s6 = int_to_ptr.vmem [resolvable:$false] %s1584_s6 }
 0x165   : > { %v383_v0 = vadd.f32 %v381_v63, %v368_v26  ;;  %v410_v24 = vpop.permute.xlu0 %409  ;;  %v426_v2 = vrot.slane %v425_v3, 7  ;;  %s1586_s0 = scalar_lea.vmem %s1585_s6, 256  ;;  %p1587_p7 = scmp.lt.s32.totalorder %s2497_s21, %s1585_s6 }
 0x166   : > { %v411_v33 = vrot.slane %v410_v24, 7  ;;  %p1588_p1 = scmp.lt.s32.totalorder %s1586_s0, %s1580_s8 }
 0x167   : > { %v400_v60 = vadd.f32 %v398_v1, %v383_v0  ;;  %v428_v46 = vsel %vm427_vm8, %v426_v2, %v425_v3 }
 0x168   : > { %v413_v8 = vsel %vm412_vm7, %v411_v33, %v410_v24  ;;  %p1589_p2 = por %p1588_p1, %p1587_p7 }
 0x169   : > { %v415_v47 = vadd.f32 %v413_v8, %v400_v60  ;;  %v449_v13 = vpop.permute.xlu0 %448 }
 0x16a   : > { %v450_v14 = vrot.slane %v449_v13, 7  ;;  %p1590_p6 = pnand %p1589_p2, %p1583_p5 }
 0x16b   : > { %v430_v9 = vadd.f32 %v428_v46, %v415_v47 }
 0x16c   : > { %v452_v53 = vsel %vm451_vm14, %v450_v14, %v449_v13 }
 0x16d   : > { %v454_v15 = vmul.f32 %v452_v53, %v430_v9 }
 0x16f   : > { %v455_v34 = vadd.f32 %v454_v15, %v329_v17 }
 0x1a8   : > { %v568_v56 = vpop.permute.xlu1 %567 }
 0x1a9   : > { %v569_v20 = vrot.slane %v568_v56, 1 }
 0x1ab   : > { %v571_v49 = vsel %vm570_vm15, %v568_v56, %v569_v20 }
 0x1ac   : > { %v573_v58 = vadd.f32 %v571_v49, %v455_v34 }
 0x1b4   : > { %v679_v16 = vpop.permute.xlu0 %678 }
 0x1b5   : > { %v680_v21 = vrot.slane %v679_v16, 1 }
 0x1b7   : > { %v682_v22 = vsel %vm681_vm1, %v679_v16, %v680_v21 }
 0x1b8   : > { %v684_v29 = vadd.f32 %v682_v22, %v573_v58 }
 0x1c1   : > { %v791_v43 = vpop.permute.xlu1 %790 }
 0x1c2   : > { %v792_v23 = vrot.slane %v791_v43, 1 }
 0x1c4   : > { %v794_v51 = vsel %vm793_vm2, %v791_v43, %v792_v23 }
 0x1c5   : > { %v796_v57 = vadd.f32 %v794_v51, %v684_v29 }
 0x1c9   : > { %v916_v62 = vpop.permute.xlu0 %915 }
 0x1ca   : > { %v917_v19 = vrot.slane %v916_v62, 1 }
 0x1cc   : > { %v1034_v7 = vpop.permute.xlu1 %1033  ;;  %v919_v44 = vsel %vm918_vm3, %v916_v62, %v917_v19 }
 0x1cd   : > { %v1035_v36 = vrot.slane %v1034_v7, 1  ;;  %v921_v4 = vadd.f32 %v919_v44, %v796_v57 }
 0x1cf   : > { %v1037_v32 = vsel %vm1036_vm4, %v1034_v7, %v1035_v36 }
 0x1d0   : > { %v1039_v27 = vadd.f32 %v1037_v32, %v921_v4 }
 0x1d3   : > { %v1145_v5 = vpop.permute.xlu0 %1144 }
 0x1d4   : > { %v1146_v52 = vrot.slane %v1145_v5, 1 }
 0x1d6   : > { %v1148_v38 = vsel %vm1147_vm5, %v1145_v5, %v1146_v52 }
 0x1d7   : > { %v1150_v37 = vadd.f32 %v1148_v38, %v1039_v27 }
 0x1d9   : > { %v1402_v39 = vmul.f32 -1.442695, %v1150_v37 }
 0x1db   : > { %1502 = vpow2.f32 %v1402_v39 }
 0x1e5   : > { %v1503_v40 = vpop.eup %1502 }
 0x1e6   : > { %v1154_v30 = vadd.f32 1.0, %v1503_v40 }
 0x1e8   : > { %1504 = vrcp.f32 %v1154_v30 }
 0x1f2   : > { %v1505_v42 = vpop.eup %1504 }
 0x1f3   : > { %v1169_v35 = vrot.slane %v1505_v42, %v1168_v18  ;;  %v1161_v45 = vrot.slane %v1505_v42, %v1160_v59  ;;  %v1165_v28 = vrot.slane %v1505_v42, %v1164_v10 }
 0x1f5   : > { %1173 = vrot.lane.b32.xlu0 %v1169_v35, %s1679_s14  ;;  %v1170_v48 = vcombine.low %v1161_v45, %v1165_v28 }
 0x1f7   : > { %1171 = vrot.lane.b32.xlu1 %v1170_v48, %s1679_s14 }
 0x267   : > { %v1174_v6 = vpop.permute.xlu0 %1173 }
 0x268   : > { %v1176_v41 = vrot.slane %v1174_v6, 4 }
 0x269   : > { %v1172_v11 = vpop.permute.xlu1 %1171 }
 0x26a   : > { %v1175_v50 = vrot.slane %v1172_v11, 4 }
 0x26c   : > { %v1177_v25 = vsel %vm254_vm0, %v1175_v50, %v1176_v41 }
 0x26d   : > { %v1179_v12 = vsel %vm1178_vm6, %v1172_v11, %v1177_v25 }
 0x26e   : > { %v1181_v55 = vmul.f32 %v1506_v54, %v1179_v12 }
 0x270   : > { %1182 = vst [vmem:[%s241_s15] sm:$0xff] %v1181_v55 }
 0x271   : > { %1593 = shalt.err (!%p1590_p6)
}
 0x272   : > { %s1594_s10 = scalar_lea.hbm %s2495_s27, 128  ;;  %s1598_s24 = scalar_lea.hbm %s2543_s4, 256 }
 0x273   : > { %p1595_p13 = scmp.ne.s32.totalorder %s2495_s27, %s1594_s10  ;;  %p1599_p0 = scmp.lt.u32.totalorder %s2495_s27, %s2543_s4 }
 0x274   : > { %p1600_p4 = scmp.lt.u32.totalorder %s1598_s24, %s1594_s10  ;;  %p1602_p3 = scmp.lt.u32.totalorder %s1594_s10, %s2495_s27 }
 0x275   : > { %p1596_p10 = pnand %p1595_p13, %p2583_p11 }
 0x276   : > { %p1601_p8 = por %p1600_p4, %p1599_p0 }
 0x277   : > { %p1597_p12 = pneg %p1596_p10 }
 0x278   : > { %p1603_p9 = por %p1602_p3, %p1601_p8 }
 0x27a   : > { %p1604_p5 = pnand %p1603_p9, %p1597_p12 }
 0x27c   : > { %1607 = shalt.err (!%p1604_p5)
}
 0x27d   : > { %1420 = dma.vmem_to_hbm [thread:$0]  (%p2583_p11), %s2497_s21, 128, %s2495_s27, %s1184_s1  }
 0x27e PF: > { %s1210_s16 = sand.u32 1, %s1642_s17   ;;  %p2584_p7 = scmp.ne.s32.totalorder %s2562_s23, 0 }
 0x27f   : > { %p2585_p1 = scmp.ge.s32.totalorder %s1654_s20, 2  ;;  %s1211_s2 = scalar_lea.sflag [#allocation6], %s1210_s16 }
 0x281   : > { %p1434_p2 = pnand %p2585_p1, %p2584_p7 }
 0x283   : > { %1637 = dma.done.wait (!%p1434_p2), %s1211_s2, 128  }
 0x284   : > { %1639 = vsyncadd (!%p1434_p2), %s1211_s2, 4294967168  ;;  %s2586_s11 = sld [smem:[#allocation16_spill]]  ;;  %p20_p6 = scmp.ge.s32.totalorder %s1768_s5, 4  }
 0x285   : > { %s2587_s17 = smov %s1646_s18  ;;  %s2588_s18 = smov %s1650_s19 }
 0x286   : > { %s2590_s20 = smov %s1768_s5  ;;  %22 = sbr.rel (!%p20_p6) target bundleno = 12 (0xc), region = 92 }
 0x28a   : > { %s2589_s19 = smov %s2586_s11 }
 0x28d   :  { %1216 = vsyncpa [#allocation5], 1 }
 0x28e   :  { %1218 = vsyncpa [#allocation5 + $0x1], 1 }
 0x28f   :  { %1219 = vsyncpa [#allocation10], 1 }
 0x290   :  { %1221 = vsyncpa [#allocation10 + $0x1], 1 }
 0x291   :  { %1222 = vsyncpa [#allocation6], 1 }
 0x292   :  { %1224 = vsyncpa [#allocation6 + $0x1], 1 }
 0x293   :  { %1225 = vsyncpa [#allocation7], 1 }
 0x294   :  { %1227 = vsyncpa [#allocation7 + $0x1], 1 }

</bundles_post_ra>
